<compile_context>
chip_gen: v6e
topology: v6e:2x2x1
jax: 0.10.0
libtpu: 0.0.40
codegen_flags: <defaults>
</compile_context>

<pallas_src>
import functools

import jax
import jax.numpy as jnp
from jax import lax
from jax.experimental import pallas as pl
from jax.experimental.pallas import tpu as pltpu

EPS = 1e-5


def _shufflenet_unit_kernel(x_ref, prm_ref, out_ref, *, W, Cb):
    """Grid step p==0: identity half -> even output channels (plain copy).
       Grid step p==1: branch half   -> odd output channels (conv/BN chain).

    x_ref:   (N, Cb, HW)     current channel half (channels on sublanes,
                             flattened spatial, lane-dense, on lanes)
    prm_ref: (Cb, 2*Cb+15)   packed parameters (see wrapper for column map)
    out_ref: (N, Cb, HW)     lanes [p*HW,(p+1)*HW) of the (N, Cb, 2*HW) output,
                             i.e. channel shuffle folded into the out_spec
    """
    N, _, HW = x_ref.shape
    p = pl.program_id(0)

    @pl.when(p == 0)
    def _copy_identity():
        out_ref[...] = x_ref[...]

    @pl.when(p == 1)
    def _compute_branch():
        inv_m = 1.0 / float(N * HW)
        PAD = pl.cdiv(W + 1, 128) * 128          # lane-aligned zero halo >= W+1

        # Packed parameters: one tiny lane-dense block, only static lane slices.
        O_W1, O_W3, O_DW, O_GB = 0, Cb, 2 * Cb, 2 * Cb + 9
        prm = prm_ref[...].astype(jnp.float32)
        w1t = prm[:, O_W1:O_W1 + Cb]             # (Cout, Cin)
        w3t = prm[:, O_W3:O_W3 + Cb]

        def gamma_beta(k):
            g = prm[:, O_GB + 2 * k:O_GB + 2 * k + 1]      # (Cb, 1)
            b = prm[:, O_GB + 2 * k + 1:O_GB + 2 * k + 2]  # (Cb, 1)
            return g, b

        # Per-image channel-major slabs (Cb, HW): full lane density.
        hs = [x_ref[n].astype(jnp.float32) for n in range(N)]

        def conv1x1(hs, wt):
            # (Cout,1) x (1,HW) broadcast FMAs: Cb exact-f32 full-width terms.
            # TODO(synk): at production widths (Cb>=58) pad channels to the MXU
            # tile and use a bf16 jnp.dot (preferred_element_type=f32) instead.
            outs = []
            for h in hs:
                acc = wt[:, 0:1] * h[0:1, :]
                for ci in range(1, Cb):
                    acc = acc + wt[:, ci:ci + 1] * h[ci:ci + 1, :]
                outs.append(acc)
            return outs

        def bn(hs, k, relu):
            # Training-mode BatchNorm, two-pass centred stats (biased var).
            g, b = gamma_beta(k)
            tot = hs[0].sum(axis=1, keepdims=True)
            for h in hs[1:]:
                tot = tot + h.sum(axis=1, keepdims=True)
            mean = tot * inv_m                               # (Cb, 1)
            var = None
            for h in hs:
                d = h - mean
                s = jnp.sum(d * d, axis=1, keepdims=True)
                var = s if var is None else var + s
            var = var * inv_m
            scale = g * lax.rsqrt(var + EPS)
            shift = b - mean * scale
            if relu:
                return [jnp.maximum(h * scale + shift, 0.0) for h in hs]
            return [h * scale + shift for h in hs]

        # 3x3 depthwise conv on the flat spatial axis, kept in vregs:
        # zero halo supplies the top/bottom (vertical) padding, lane masks kill
        # horizontal row wrap-around.  (pltpu.roll taps are an equivalent
        # scratch-free alternative.)
        col = lax.broadcasted_iota(jnp.int32, (Cb, HW), 1) % W
        mask_l = (col >= 1).astype(jnp.float32)      # dx = -1 valid iff x >= 1
        mask_r = (col <= W - 2).astype(jnp.float32)  # dx = +1 valid iff x <= W-2
        zpad = jnp.zeros((Cb, PAD), jnp.float32)

        def dwconv3x3(h):
            hp = jnp.concatenate([zpad, h, zpad], axis=1)    # aligned concat
            acc = None
            for ky in range(3):
                for kx in range(3):
                    dy, dx = ky - 1, kx - 1
                    wk = prm[:, O_DW + 3 * ky + kx:O_DW + 3 * ky + kx + 1]
                    off = PAD + dy * W + dx                  # static lane offset
                    term = wk * hp[:, off:off + HW]
                    if dx == -1:
                        term = term * mask_l
                    elif dx == 1:
                        term = term * mask_r
                    acc = term if acc is None else acc + term
            return acc

        hs = conv1x1(hs, w1t)
        hs = bn(hs, 0, relu=True)
        hs = [dwconv3x3(h) for h in hs]
        hs = bn(hs, 1, relu=False)
        hs = conv1x1(hs, w3t)
        hs = bn(hs, 2, relu=True)

        for n in range(N):
            out_ref[n] = hs[n].astype(out_ref.dtype)


def shufflenet_v2_unit(x_nchw, params):
    """PyTorch ShuffleNetV2Unit forward (non-downsample), training-mode BN."""
    N, C, H, W = x_nchw.shape
    Cb = C // 2
    HW = H * W
    assert HW % 128 == 0, "flattened spatial extent must be lane-aligned"

    # Free, contiguous reshape only (no transpose / extra HBM pass): the input
    # BlockSpec selects the identity/branch half along dim 1.
    x_r = x_nchw.reshape(N, 2, Cb, HW)

    # Pack every parameter into ONE (Cb, 2*Cb+15) f32 array, rows = channels:
    #   cols [0, Cb)          : w1^T (Cout, Cin)
    #   cols [Cb, 2Cb)        : w3^T
    #   cols [2Cb, 2Cb+9)     : depthwise taps, col = ky*3 + kx
    #   cols [2Cb+9, 2Cb+15)  : g1, b1, g2, b2, g3, b3
    f32 = jnp.float32
    w1t = params["w1"].astype(f32).T
    w3t = params["w3"].astype(f32).T
    wdw = params["w_dw"].astype(f32).reshape(9, Cb).T
    gb = jnp.stack([params["g1"], params["b1"],
                    params["g2"], params["b2"],
                    params["g3"], params["b3"]], axis=1).astype(f32)
    prm = jnp.concatenate([w1t, w3t, wdw, gb], axis=1)       # (Cb, 2*Cb+15)

    kernel = functools.partial(_shufflenet_unit_kernel, W=W, Cb=Cb)

    # Output layout (N, Cb, 2*HW): lanes [0,HW) = even (identity) channels,
    # lanes [HW,2HW) = odd (branch) channels -> reshaping to (N, C, H, W) below
    # directly yields channel_shuffle(cat(identity, branch), 2).
    out = pl.pallas_call(
        kernel,
        out_shape=jax.ShapeDtypeStruct((N, Cb, 2 * HW), x_nchw.dtype),
        grid=(2,),
        in_specs=[
            pl.BlockSpec((N, None, Cb, HW), lambda p: (0, p, 0, 0)),
            pl.BlockSpec(prm.shape, lambda p: (0, 0)),
        ],
        out_specs=pl.BlockSpec((N, Cb, HW), lambda p: (0, 0, p)),
        compiler_params=pltpu.CompilerParams(
            dimension_semantics=("parallel",)),
    )(x_r, prm)

    return out.reshape(N, C, H, W)


# -------------------- pure-JAX reference (PyTorch-faithful, NCHW) ------------
def _conv_ref(x, w, stride=1, padding=0, groups=1):
    return lax.conv_general_dilated(
        x, w, window_strides=(stride, stride),
        padding=[(padding, padding)] * 2,
        dimension_numbers=("NCHW", "OIHW", "NCHW"),
        feature_group_count=groups,
        precision=lax.Precision.HIGHEST)


def _bn_ref(x, g, b):
    mean = jnp.mean(x, axis=(0, 2, 3), keepdims=True)
    var = jnp.mean((x - mean) ** 2, axis=(0, 2, 3), keepdims=True)
    return ((x - mean) * lax.rsqrt(var + EPS) * g[None, :, None, None]
            + b[None, :, None, None])


def _channel_shuffle_ref(x, groups):
    N, C, H, W = x.shape
    return (x.reshape(N, groups, C // groups, H, W)
             .transpose(0, 2, 1, 3, 4)
             .reshape(N, C, H, W))


def torch_ref(x, p):
    N, C, H, W = x.shape
    Cb = C // 2
    identity = x[:, :Cb]
    h = x[:, Cb:]
    h = _conv_ref(h, p["w1"].T[:, :, None, None])
    h = jnp.maximum(_bn_ref(h, p["g1"], p["b1"]), 0.0)
    wdw_oihw = jnp.transpose(p["w_dw"], (2, 0, 1))[:, None, :, :]
    h = _conv_ref(h, wdw_oihw, stride=1, padding=1, groups=Cb)
    h = _bn_ref(h, p["g2"], p["b2"])
    h = _conv_ref(h, p["w3"].T[:, :, None, None])
    h = jnp.maximum(_bn_ref(h, p["g3"], p["b3"]), 0.0)
    out = jnp.concatenate([identity, h], axis=1)
    return _channel_shuffle_ref(out, 2)


if __name__ == "__main__":
    key = jax.random.PRNGKey(0)
    N, C, H, W = 2, 8, 16, 16            # in_channels = out_channels = 8
    Cb = C // 2                          # branch channels = 4
    ks = jax.random.split(key, 10)
    x = jax.random.normal(ks[0], (N, C, H, W), jnp.float32)
    params = {
        "w1":   0.3 * jax.random.normal(ks[1], (Cb, Cb), jnp.float32),    # (Cin, Cout)
        "w_dw": 0.3 * jax.random.normal(ks[2], (3, 3, Cb), jnp.float32),  # (kh, kw, C)
        "w3":   0.3 * jax.random.normal(ks[3], (Cb, Cb), jnp.float32),
        "g1": 1.0 + 0.1 * jax.random.normal(ks[4], (Cb,), jnp.float32),
        "b1": 0.1 * jax.random.normal(ks[5], (Cb,), jnp.float32),
        "g2": 1.0 + 0.1 * jax.random.normal(ks[6], (Cb,), jnp.float32),
        "b2": 0.1 * jax.random.normal(ks[7], (Cb,), jnp.float32),
        "g3": 1.0 + 0.1 * jax.random.normal(ks[8], (Cb,), jnp.float32),
        "b3": 0.1 * jax.random.normal(ks[9], (Cb,), jnp.float32),
    }

    out = jax.block_until_ready(shufflenet_v2_unit(x, params))
    ref = jax.block_until_ready(torch_ref(x, params))
    assert out.shape == (N, C, H, W), out.shape
    assert jnp.allclose(out, ref, atol=1e-3, rtol=1e-3), float(
        jnp.max(jnp.abs(out - ref)))
    print("KERNEL_OK")
</pallas_src>

<mosaic_0001>
module attributes {stable_mosaic.version = 11 : i64} {
  func.func @_shufflenet_unit_kernel(%arg0: i32, %arg1: memref<2x1x4x256xf32, #tpu.memory_space<vmem>>, %arg2: memref<4x23xf32, #tpu.memory_space<vmem>>, %arg3: memref<2x4x256xf32, #tpu.memory_space<vmem>>) attributes {dimension_semantics = [#tpu.dimension_semantics<parallel>], iteration_bounds = array<i64: 2>, scalar_prefetch = 0 : i64, scratch_operands = 0 : i64, tpu.core_type = #tpu.core_type<tc>, window_params = [{transform_indices = @transform_0, window_bounds = array<i64: 2, 1, 4, 256>}, {pipeline_mode = #tpu.pipeline_mode<synchronous>, transform_indices = @transform_1, window_bounds = array<i64: 4, 23>}, {transform_indices = @transform_2, window_bounds = array<i64: 2, 4, 256>}]} {
    %c0_i32 = arith.constant 0 : i32
    %0 = arith.cmpi eq, %arg0, %c0_i32 : i32
    %1 = arith.extui %0 : i1 to i32
    %c0_i32_0 = arith.constant 0 : i32
    %2 = arith.cmpi ne, %1, %c0_i32_0 : i32
    scf.if %2 {
      %c0 = arith.constant 0 : index
      %c0_2 = arith.constant 0 : index
      %c0_3 = arith.constant 0 : index
      %c0_4 = arith.constant 0 : index
      %6 = vector.load %arg1[%c0, %c0_2, %c0_3, %c0_4] : memref<2x1x4x256xf32, #tpu.memory_space<vmem>>, vector<2x1x4x256xf32>
      %7 = vector.shape_cast %6 : vector<2x1x4x256xf32> to vector<2x4x256xf32>
      %c0_5 = arith.constant 0 : index
      %c0_6 = arith.constant 0 : index
      %c0_7 = arith.constant 0 : index
      %8 = vector.load %arg3[%c0_5, %c0_6, %c0_7] : memref<2x4x256xf32, #tpu.memory_space<vmem>>, vector<2x4x256xf32>
      tpu.vector_store %arg3[%c0_5, %c0_6, %c0_7], %7 {strides = array<i32>} : memref<2x4x256xf32, #tpu.memory_space<vmem>>, vector<2x4x256xf32>,
    } else {
    }
    %c1_i32 = arith.constant 1 : i32
    %3 = arith.cmpi eq, %arg0, %c1_i32 : i32
    %4 = arith.extui %3 : i1 to i32
    %c0_i32_1 = arith.constant 0 : i32
    %5 = arith.cmpi ne, %4, %c0_i32_1 : i32
    scf.if %5 {
      %c0 = arith.constant 0 : index
      %c0_2 = arith.constant 0 : index
      %6 = vector.load %arg2[%c0, %c0_2] : memref<4x23xf32, #tpu.memory_space<vmem>>, vector<4x23xf32>
      %7 = vector.extract_strided_slice %6 {offsets = [0, 0], sizes = [4, 4], strides = [1, 1]} : vector<4x23xf32> to vector<4x4xf32>
      %8 = vector.extract_strided_slice %6 {offsets = [0, 4], sizes = [4, 4], strides = [1, 1]} : vector<4x23xf32> to vector<4x4xf32>
      %c0_3 = arith.constant 0 : index
      %c0_4 = arith.constant 0 : index
      %c0_5 = arith.constant 0 : index
      %c0_6 = arith.constant 0 : index
      %9 = vector.load %arg1[%c0_3, %c0_4, %c0_5, %c0_6] : memref<2x1x4x256xf32, #tpu.memory_space<vmem>>, vector<1x1x4x256xf32>
      %10 = vector.shape_cast %9 : vector<1x1x4x256xf32> to vector<4x256xf32>
      %c1 = arith.constant 1 : index
      %c0_7 = arith.constant 0 : index
      %c0_8 = arith.constant 0 : index
      %c0_9 = arith.constant 0 : index
      %11 = vector.load %arg1[%c1, %c0_7, %c0_8, %c0_9] : memref<2x1x4x256xf32, #tpu.memory_space<vmem>>, vector<1x1x4x256xf32>
      %12 = vector.shape_cast %11 : vector<1x1x4x256xf32> to vector<4x256xf32>
      %13 = tpu.iota {dimensions = array<i32: 1>} : vector<4x256xi32>
      %c16_i32 = arith.constant 16 : i32
      %c0_i32_10 = arith.constant 0 : i32
      %14 = arith.cmpi eq, %c16_i32, %c0_i32_10 : i32
      %c1_i32_11 = arith.constant 1 : i32
      %15 = arith.select %14, %c1_i32_11, %c16_i32 : i32
      %16 = vector.broadcast %15 : i32 to vector<4x256xi32>
      %17 = arith.remsi %13, %16 : vector<4x256xi32>
      %c0_i32_12 = arith.constant 0 : i32
      %18 = vector.broadcast %c0_i32_12 : i32 to vector<4x256xi32>
      %19 = arith.cmpi ne, %17, %18 : vector<4x256xi32>
      %c0_i32_13 = arith.constant 0 : i32
      %20 = vector.broadcast %c0_i32_13 : i32 to vector<4x256xi32>
      %21 = arith.cmpi slt, %17, %20 : vector<4x256xi32>
      %c0_i32_14 = arith.constant 0 : i32
      %22 = arith.cmpi slt, %15, %c0_i32_14 : i32
      %23 = vector.broadcast %22 : i1 to vector<4x256xi1>
      %24 = vector.broadcast %23 : vector<4x256xi1> to vector<4x256xi1>
      %25 = arith.xori %21, %24 : vector<4x256xi1>
      %26 = arith.andi %25, %19 : vector<4x256xi1>
      %27 = vector.broadcast %15 : i32 to vector<4x256xi32>
      %28 = arith.addi %17, %27 : vector<4x256xi32>
      %29 = arith.select %26, %28, %17 : vector<4x256xi1>, vector<4x256xi32>
      %c1_i32_15 = arith.constant 1 : i32
      %30 = vector.broadcast %c1_i32_15 : i32 to vector<4x256xi32>
      %31 = arith.cmpi sge, %29, %30 : vector<4x256xi32>
      %32 = arith.extui %31 : vector<4x256xi1> to vector<4x256xi32>
      %33 = arith.sitofp %32 : vector<4x256xi32> to vector<4x256xf32>
      %c14_i32 = arith.constant 14 : i32
      %34 = vector.broadcast %c14_i32 : i32 to vector<4x256xi32>
      %35 = arith.cmpi sle, %29, %34 : vector<4x256xi32>
      %36 = arith.extui %35 : vector<4x256xi1> to vector<4x256xi32>
      %37 = arith.sitofp %36 : vector<4x256xi32> to vector<4x256xf32>
      %cst = arith.constant 0.000000e+00 : f32
      %38 = vector.broadcast %cst : f32 to vector<4x128xf32>
      %39 = vector.extract_strided_slice %7 {offsets = [0, 0], sizes = [4, 1], strides = [1, 1]} : vector<4x4xf32> to vector<4x1xf32>
      %40 = vector.extract_strided_slice %10 {offsets = [0, 0], sizes = [1, 256], strides = [1, 1]} : vector<4x256xf32> to vector<1x256xf32>
      %41 = vector.broadcast %39 : vector<4x1xf32> to vector<4x256xf32>
      %42 = vector.broadcast %40 : vector<1x256xf32> to vector<4x256xf32>
      %43 = arith.mulf %41, %42 : vector<4x256xf32>
      %44 = vector.extract_strided_slice %7 {offsets = [0, 1], sizes = [4, 1], strides = [1, 1]} : vector<4x4xf32> to vector<4x1xf32>
      %45 = vector.extract_strided_slice %10 {offsets = [1, 0], sizes = [1, 256], strides = [1, 1]} : vector<4x256xf32> to vector<1x256xf32>
      %46 = vector.broadcast %44 : vector<4x1xf32> to vector<4x256xf32>
      %47 = vector.broadcast %45 : vector<1x256xf32> to vector<4x256xf32>
      %48 = arith.mulf %46, %47 : vector<4x256xf32>
      %49 = arith.addf %43, %48 : vector<4x256xf32>
      %50 = vector.extract_strided_slice %7 {offsets = [0, 2], sizes = [4, 1], strides = [1, 1]} : vector<4x4xf32> to vector<4x1xf32>
      %51 = vector.extract_strided_slice %10 {offsets = [2, 0], sizes = [1, 256], strides = [1, 1]} : vector<4x256xf32> to vector<1x256xf32>
      %52 = vector.broadcast %50 : vector<4x1xf32> to vector<4x256xf32>
      %53 = vector.broadcast %51 : vector<1x256xf32> to vector<4x256xf32>
      %54 = arith.mulf %52, %53 : vector<4x256xf32>
      %55 = arith.addf %49, %54 : vector<4x256xf32>
      %56 = vector.extract_strided_slice %7 {offsets = [0, 3], sizes = [4, 1], strides = [1, 1]} : vector<4x4xf32> to vector<4x1xf32>
      %57 = vector.extract_strided_slice %10 {offsets = [3, 0], sizes = [1, 256], strides = [1, 1]} : vector<4x256xf32> to vector<1x256xf32>
      %58 = vector.broadcast %56 : vector<4x1xf32> to vector<4x256xf32>
      %59 = vector.broadcast %57 : vector<1x256xf32> to vector<4x256xf32>
      %60 = arith.mulf %58, %59 : vector<4x256xf32>
      %61 = arith.addf %55, %60 : vector<4x256xf32>
      %62 = vector.extract_strided_slice %7 {offsets = [0, 0], sizes = [4, 1], strides = [1, 1]} : vector<4x4xf32> to vector<4x1xf32>
      %63 = vector.extract_strided_slice %12 {offsets = [0, 0], sizes = [1, 256], strides = [1, 1]} : vector<4x256xf32> to vector<1x256xf32>
      %64 = vector.broadcast %62 : vector<4x1xf32> to vector<4x256xf32>
      %65 = vector.broadcast %63 : vector<1x256xf32> to vector<4x256xf32>
      %66 = arith.mulf %64, %65 : vector<4x256xf32>
      %67 = vector.extract_strided_slice %7 {offsets = [0, 1], sizes = [4, 1], strides = [1, 1]} : vector<4x4xf32> to vector<4x1xf32>
      %68 = vector.extract_strided_slice %12 {offsets = [1, 0], sizes = [1, 256], strides = [1, 1]} : vector<4x256xf32> to vector<1x256xf32>
      %69 = vector.broadcast %67 : vector<4x1xf32> to vector<4x256xf32>
      %70 = vector.broadcast %68 : vector<1x256xf32> to vector<4x256xf32>
      %71 = arith.mulf %69, %70 : vector<4x256xf32>
      %72 = arith.addf %66, %71 : vector<4x256xf32>
      %73 = vector.extract_strided_slice %7 {offsets = [0, 2], sizes = [4, 1], strides = [1, 1]} : vector<4x4xf32> to vector<4x1xf32>
      %74 = vector.extract_strided_slice %12 {offsets = [2, 0], sizes = [1, 256], strides = [1, 1]} : vector<4x256xf32> to vector<1x256xf32>
      %75 = vector.broadcast %73 : vector<4x1xf32> to vector<4x256xf32>
      %76 = vector.broadcast %74 : vector<1x256xf32> to vector<4x256xf32>
      %77 = arith.mulf %75, %76 : vector<4x256xf32>
      %78 = arith.addf %72, %77 : vector<4x256xf32>
      %79 = vector.extract_strided_slice %7 {offsets = [0, 3], sizes = [4, 1], strides = [1, 1]} : vector<4x4xf32> to vector<4x1xf32>
      %80 = vector.extract_strided_slice %12 {offsets = [3, 0], sizes = [1, 256], strides = [1, 1]} : vector<4x256xf32> to vector<1x256xf32>
      %81 = vector.broadcast %79 : vector<4x1xf32> to vector<4x256xf32>
      %82 = vector.broadcast %80 : vector<1x256xf32> to vector<4x256xf32>
      %83 = arith.mulf %81, %82 : vector<4x256xf32>
      %84 = arith.addf %78, %83 : vector<4x256xf32>
      %85 = vector.extract_strided_slice %6 {offsets = [0, 17], sizes = [4, 1], strides = [1, 1]} : vector<4x23xf32> to vector<4x1xf32>
      %86 = vector.extract_strided_slice %6 {offsets = [0, 18], sizes = [4, 1], strides = [1, 1]} : vector<4x23xf32> to vector<4x1xf32>
      %cst_16 = arith.constant dense<0.000000e+00> : vector<4xf32>
      %87 = vector.multi_reduction <add>, %61, %cst_16 [1] : vector<4x256xf32> to vector<4xf32>
      %88 = vector.shape_cast %87 : vector<4xf32> to vector<4x1xf32>
      %cst_17 = arith.constant dense<0.000000e+00> : vector<4xf32>
      %89 = vector.multi_reduction <add>, %84, %cst_17 [1] : vector<4x256xf32> to vector<4xf32>
      %90 = vector.shape_cast %89 : vector<4xf32> to vector<4x1xf32>
      %91 = arith.addf %88, %90 : vector<4x1xf32>
      %cst_18 = arith.constant 0.001953125 : f32
      %92 = vector.broadcast %cst_18 : f32 to vector<4x1xf32>
      %93 = arith.mulf %91, %92 : vector<4x1xf32>
      %94 = vector.broadcast %93 : vector<4x1xf32> to vector<4x256xf32>
      %95 = arith.subf %61, %94 : vector<4x256xf32>
      %96 = arith.mulf %95, %95 : vector<4x256xf32>
      %cst_19 = arith.constant dense<0.000000e+00> : vector<4xf32>
      %97 = vector.multi_reduction <add>, %96, %cst_19 [1] : vector<4x256xf32> to vector<4xf32>
      %98 = vector.shape_cast %97 : vector<4xf32> to vector<4x1xf32>
      %99 = vector.broadcast %93 : vector<4x1xf32> to vector<4x256xf32>
      %100 = arith.subf %84, %99 : vector<4x256xf32>
      %101 = arith.mulf %100, %100 : vector<4x256xf32>
      %cst_20 = arith.constant dense<0.000000e+00> : vector<4xf32>
      %102 = vector.multi_reduction <add>, %101, %cst_20 [1] : vector<4x256xf32> to vector<4xf32>
      %103 = vector.shape_cast %102 : vector<4xf32> to vector<4x1xf32>
      %104 = arith.addf %98, %103 : vector<4x1xf32>
      %cst_21 = arith.constant 0.001953125 : f32
      %105 = vector.broadcast %cst_21 : f32 to vector<4x1xf32>
      %106 = arith.mulf %104, %105 : vector<4x1xf32>
      %cst_22 = arith.constant 9.99999974E-6 : f32
      %107 = vector.broadcast %cst_22 : f32 to vector<4x1xf32>
      %108 = arith.addf %106, %107 : vector<4x1xf32>
      %109 = math.rsqrt %108 : vector<4x1xf32>
      %110 = arith.mulf %85, %109 : vector<4x1xf32>
      %111 = arith.mulf %93, %110 : vector<4x1xf32>
      %112 = arith.subf %86, %111 : vector<4x1xf32>
      %113 = vector.broadcast %110 : vector<4x1xf32> to vector<4x256xf32>
      %114 = arith.mulf %61, %113 : vector<4x256xf32>
      %115 = vector.broadcast %112 : vector<4x1xf32> to vector<4x256xf32>
      %116 = arith.addf %114, %115 : vector<4x256xf32>
      %cst_23 = arith.constant 0.000000e+00 : f32
      %117 = vector.broadcast %cst_23 : f32 to vector<4x256xf32>
      %118 = arith.maximumf %116, %117 : vector<4x256xf32>
      %119 = vector.broadcast %110 : vector<4x1xf32> to vector<4x256xf32>
      %120 = arith.mulf %84, %119 : vector<4x256xf32>
      %121 = vector.broadcast %112 : vector<4x1xf32> to vector<4x256xf32>
      %122 = arith.addf %120, %121 : vector<4x256xf32>
      %cst_24 = arith.constant 0.000000e+00 : f32
      %123 = vector.broadcast %cst_24 : f32 to vector<4x256xf32>
      %124 = arith.maximumf %122, %123 : vector<4x256xf32>
      %125 = tpu.concatenate %38, %118, %38 in 1 : vector<4x128xf32>, vector<4x256xf32>, vector<4x128xf32> -> vector<4x512xf32>
      %126 = vector.extract_strided_slice %6 {offsets = [0, 8], sizes = [4, 1], strides = [1, 1]} : vector<4x23xf32> to vector<4x1xf32>
      %127 = vector.extract_strided_slice %125 {offsets = [0, 111], sizes = [4, 256], strides = [1, 1]} : vector<4x512xf32> to vector<4x256xf32>
      %128 = vector.broadcast %126 : vector<4x1xf32> to vector<4x256xf32>
      %129 = arith.mulf %128, %127 : vector<4x256xf32>
      %130 = arith.mulf %129, %33 : vector<4x256xf32>
      %131 = vector.extract_strided_slice %6 {offsets = [0, 9], sizes = [4, 1], strides = [1, 1]} : vector<4x23xf32> to vector<4x1xf32>
      %132 = vector.extract_strided_slice %125 {offsets = [0, 112], sizes = [4, 256], strides = [1, 1]} : vector<4x512xf32> to vector<4x256xf32>
      %133 = vector.broadcast %131 : vector<4x1xf32> to vector<4x256xf32>
      %134 = arith.mulf %133, %132 : vector<4x256xf32>
      %135 = arith.addf %130, %134 : vector<4x256xf32>
      %136 = vector.extract_strided_slice %6 {offsets = [0, 10], sizes = [4, 1], strides = [1, 1]} : vector<4x23xf32> to vector<4x1xf32>
      %137 = vector.extract_strided_slice %125 {offsets = [0, 113], sizes = [4, 256], strides = [1, 1]} : vector<4x512xf32> to vector<4x256xf32>
      %138 = vector.broadcast %136 : vector<4x1xf32> to vector<4x256xf32>
      %139 = arith.mulf %138, %137 : vector<4x256xf32>
      %140 = arith.mulf %139, %37 : vector<4x256xf32>
      %141 = arith.addf %135, %140 : vector<4x256xf32>
      %142 = vector.extract_strided_slice %6 {offsets = [0, 11], sizes = [4, 1], strides = [1, 1]} : vector<4x23xf32> to vector<4x1xf32>
      %143 = vector.extract_strided_slice %125 {offsets = [0, 127], sizes = [4, 256], strides = [1, 1]} : vector<4x512xf32> to vector<4x256xf32>
      %144 = vector.broadcast %142 : vector<4x1xf32> to vector<4x256xf32>
      %145 = arith.mulf %144, %143 : vector<4x256xf32>
      %146 = arith.mulf %145, %33 : vector<4x256xf32>
      %147 = arith.addf %141, %146 : vector<4x256xf32>
      %148 = vector.extract_strided_slice %6 {offsets = [0, 12], sizes = [4, 1], strides = [1, 1]} : vector<4x23xf32> to vector<4x1xf32>
      %149 = vector.extract_strided_slice %125 {offsets = [0, 128], sizes = [4, 256], strides = [1, 1]} : vector<4x512xf32> to vector<4x256xf32>
      %150 = vector.broadcast %148 : vector<4x1xf32> to vector<4x256xf32>
      %151 = arith.mulf %150, %149 : vector<4x256xf32>
      %152 = arith.addf %147, %151 : vector<4x256xf32>
      %153 = vector.extract_strided_slice %6 {offsets = [0, 13], sizes = [4, 1], strides = [1, 1]} : vector<4x23xf32> to vector<4x1xf32>
      %154 = vector.extract_strided_slice %125 {offsets = [0, 129], sizes = [4, 256], strides = [1, 1]} : vector<4x512xf32> to vector<4x256xf32>
      %155 = vector.broadcast %153 : vector<4x1xf32> to vector<4x256xf32>
      %156 = arith.mulf %155, %154 : vector<4x256xf32>
      %157 = arith.mulf %156, %37 : vector<4x256xf32>
      %158 = arith.addf %152, %157 : vector<4x256xf32>
      %159 = vector.extract_strided_slice %6 {offsets = [0, 14], sizes = [4, 1], strides = [1, 1]} : vector<4x23xf32> to vector<4x1xf32>
      %160 = vector.extract_strided_slice %125 {offsets = [0, 143], sizes = [4, 256], strides = [1, 1]} : vector<4x512xf32> to vector<4x256xf32>
      %161 = vector.broadcast %159 : vector<4x1xf32> to vector<4x256xf32>
      %162 = arith.mulf %161, %160 : vector<4x256xf32>
      %163 = arith.mulf %162, %33 : vector<4x256xf32>
      %164 = arith.addf %158, %163 : vector<4x256xf32>
      %165 = vector.extract_strided_slice %6 {offsets = [0, 15], sizes = [4, 1], strides = [1, 1]} : vector<4x23xf32> to vector<4x1xf32>
      %166 = vector.extract_strided_slice %125 {offsets = [0, 144], sizes = [4, 256], strides = [1, 1]} : vector<4x512xf32> to vector<4x256xf32>
      %167 = vector.broadcast %165 : vector<4x1xf32> to vector<4x256xf32>
      %168 = arith.mulf %167, %166 : vector<4x256xf32>
      %169 = arith.addf %164, %168 : vector<4x256xf32>
      %170 = vector.extract_strided_slice %6 {offsets = [0, 16], sizes = [4, 1], strides = [1, 1]} : vector<4x23xf32> to vector<4x1xf32>
      %171 = vector.extract_strided_slice %125 {offsets = [0, 145], sizes = [4, 256], strides = [1, 1]} : vector<4x512xf32> to vector<4x256xf32>
      %172 = vector.broadcast %170 : vector<4x1xf32> to vector<4x256xf32>
      %173 = arith.mulf %172, %171 : vector<4x256xf32>
      %174 = arith.mulf %173, %37 : vector<4x256xf32>
      %175 = arith.addf %169, %174 : vector<4x256xf32>
      %176 = tpu.concatenate %38, %124, %38 in 1 : vector<4x128xf32>, vector<4x256xf32>, vector<4x128xf32> -> vector<4x512xf32>
      %177 = vector.extract_strided_slice %6 {offsets = [0, 8], sizes = [4, 1], strides = [1, 1]} : vector<4x23xf32> to vector<4x1xf32>
      %178 = vector.extract_strided_slice %176 {offsets = [0, 111], sizes = [4, 256], strides = [1, 1]} : vector<4x512xf32> to vector<4x256xf32>
      %179 = vector.broadcast %177 : vector<4x1xf32> to vector<4x256xf32>
      %180 = arith.mulf %179, %178 : vector<4x256xf32>
      %181 = arith.mulf %180, %33 : vector<4x256xf32>
      %182 = vector.extract_strided_slice %6 {offsets = [0, 9], sizes = [4, 1], strides = [1, 1]} : vector<4x23xf32> to vector<4x1xf32>
      %183 = vector.extract_strided_slice %176 {offsets = [0, 112], sizes = [4, 256], strides = [1, 1]} : vector<4x512xf32> to vector<4x256xf32>
      %184 = vector.broadcast %182 : vector<4x1xf32> to vector<4x256xf32>
      %185 = arith.mulf %184, %183 : vector<4x256xf32>
      %186 = arith.addf %181, %185 : vector<4x256xf32>
      %187 = vector.extract_strided_slice %6 {offsets = [0, 10], sizes = [4, 1], strides = [1, 1]} : vector<4x23xf32> to vector<4x1xf32>
      %188 = vector.extract_strided_slice %176 {offsets = [0, 113], sizes = [4, 256], strides = [1, 1]} : vector<4x512xf32> to vector<4x256xf32>
      %189 = vector.broadcast %187 : vector<4x1xf32> to vector<4x256xf32>
      %190 = arith.mulf %189, %188 : vector<4x256xf32>
      %191 = arith.mulf %190, %37 : vector<4x256xf32>
      %192 = arith.addf %186, %191 : vector<4x256xf32>
      %193 = vector.extract_strided_slice %6 {offsets = [0, 11], sizes = [4, 1], strides = [1, 1]} : vector<4x23xf32> to vector<4x1xf32>
      %194 = vector.extract_strided_slice %176 {offsets = [0, 127], sizes = [4, 256], strides = [1, 1]} : vector<4x512xf32> to vector<4x256xf32>
      %195 = vector.broadcast %193 : vector<4x1xf32> to vector<4x256xf32>
      %196 = arith.mulf %195, %194 : vector<4x256xf32>
      %197 = arith.mulf %196, %33 : vector<4x256xf32>
      %198 = arith.addf %192, %197 : vector<4x256xf32>
      %199 = vector.extract_strided_slice %6 {offsets = [0, 12], sizes = [4, 1], strides = [1, 1]} : vector<4x23xf32> to vector<4x1xf32>
      %200 = vector.extract_strided_slice %176 {offsets = [0, 128], sizes = [4, 256], strides = [1, 1]} : vector<4x512xf32> to vector<4x256xf32>
      %201 = vector.broadcast %199 : vector<4x1xf32> to vector<4x256xf32>
      %202 = arith.mulf %201, %200 : vector<4x256xf32>
      %203 = arith.addf %198, %202 : vector<4x256xf32>
      %204 = vector.extract_strided_slice %6 {offsets = [0, 13], sizes = [4, 1], strides = [1, 1]} : vector<4x23xf32> to vector<4x1xf32>
      %205 = vector.extract_strided_slice %176 {offsets = [0, 129], sizes = [4, 256], strides = [1, 1]} : vector<4x512xf32> to vector<4x256xf32>
      %206 = vector.broadcast %204 : vector<4x1xf32> to vector<4x256xf32>
      %207 = arith.mulf %206, %205 : vector<4x256xf32>
      %208 = arith.mulf %207, %37 : vector<4x256xf32>
      %209 = arith.addf %203, %208 : vector<4x256xf32>
      %210 = vector.extract_strided_slice %6 {offsets = [0, 14], sizes = [4, 1], strides = [1, 1]} : vector<4x23xf32> to vector<4x1xf32>
      %211 = vector.extract_strided_slice %176 {offsets = [0, 143], sizes = [4, 256], strides = [1, 1]} : vector<4x512xf32> to vector<4x256xf32>
      %212 = vector.broadcast %210 : vector<4x1xf32> to vector<4x256xf32>
      %213 = arith.mulf %212, %211 : vector<4x256xf32>
      %214 = arith.mulf %213, %33 : vector<4x256xf32>
      %215 = arith.addf %209, %214 : vector<4x256xf32>
      %216 = vector.extract_strided_slice %6 {offsets = [0, 15], sizes = [4, 1], strides = [1, 1]} : vector<4x23xf32> to vector<4x1xf32>
      %217 = vector.extract_strided_slice %176 {offsets = [0, 144], sizes = [4, 256], strides = [1, 1]} : vector<4x512xf32> to vector<4x256xf32>
      %218 = vector.broadcast %216 : vector<4x1xf32> to vector<4x256xf32>
      %219 = arith.mulf %218, %217 : vector<4x256xf32>
      %220 = arith.addf %215, %219 : vector<4x256xf32>
      %221 = vector.extract_strided_slice %6 {offsets = [0, 16], sizes = [4, 1], strides = [1, 1]} : vector<4x23xf32> to vector<4x1xf32>
      %222 = vector.extract_strided_slice %176 {offsets = [0, 145], sizes = [4, 256], strides = [1, 1]} : vector<4x512xf32> to vector<4x256xf32>
      %223 = vector.broadcast %221 : vector<4x1xf32> to vector<4x256xf32>
      %224 = arith.mulf %223, %222 : vector<4x256xf32>
      %225 = arith.mulf %224, %37 : vector<4x256xf32>
      %226 = arith.addf %220, %225 : vector<4x256xf32>
      %227 = vector.extract_strided_slice %6 {offsets = [0, 19], sizes = [4, 1], strides = [1, 1]} : vector<4x23xf32> to vector<4x1xf32>
      %228 = vector.extract_strided_slice %6 {offsets = [0, 20], sizes = [4, 1], strides = [1, 1]} : vector<4x23xf32> to vector<4x1xf32>
      %cst_25 = arith.constant dense<0.000000e+00> : vector<4xf32>
      %229 = vector.multi_reduction <add>, %175, %cst_25 [1] : vector<4x256xf32> to vector<4xf32>
      %230 = vector.shape_cast %229 : vector<4xf32> to vector<4x1xf32>
      %cst_26 = arith.constant dense<0.000000e+00> : vector<4xf32>
      %231 = vector.multi_reduction <add>, %226, %cst_26 [1] : vector<4x256xf32> to vector<4xf32>
      %232 = vector.shape_cast %231 : vector<4xf32> to vector<4x1xf32>
      %233 = arith.addf %230, %232 : vector<4x1xf32>
      %cst_27 = arith.constant 0.001953125 : f32
      %234 = vector.broadcast %cst_27 : f32 to vector<4x1xf32>
      %235 = arith.mulf %233, %234 : vector<4x1xf32>
      %236 = vector.broadcast %235 : vector<4x1xf32> to vector<4x256xf32>
      %237 = arith.subf %175, %236 : vector<4x256xf32>
      %238 = arith.mulf %237, %237 : vector<4x256xf32>
      %cst_28 = arith.constant dense<0.000000e+00> : vector<4xf32>
      %239 = vector.multi_reduction <add>, %238, %cst_28 [1] : vector<4x256xf32> to vector<4xf32>
      %240 = vector.shape_cast %239 : vector<4xf32> to vector<4x1xf32>
      %241 = vector.broadcast %235 : vector<4x1xf32> to vector<4x256xf32>
      %242 = arith.subf %226, %241 : vector<4x256xf32>
      %243 = arith.mulf %242, %242 : vector<4x256xf32>
      %cst_29 = arith.constant dense<0.000000e+00> : vector<4xf32>
      %244 = vector.multi_reduction <add>, %243, %cst_29 [1] : vector<4x256xf32> to vector<4xf32>
      %245 = vector.shape_cast %244 : vector<4xf32> to vector<4x1xf32>
      %246 = arith.addf %240, %245 : vector<4x1xf32>
      %cst_30 = arith.constant 0.001953125 : f32
      %247 = vector.broadcast %cst_30 : f32 to vector<4x1xf32>
      %248 = arith.mulf %246, %247 : vector<4x1xf32>
      %cst_31 = arith.constant 9.99999974E-6 : f32
      %249 = vector.broadcast %cst_31 : f32 to vector<4x1xf32>
      %250 = arith.addf %248, %249 : vector<4x1xf32>
      %251 = math.rsqrt %250 : vector<4x1xf32>
      %252 = arith.mulf %227, %251 : vector<4x1xf32>
      %253 = arith.mulf %235, %252 : vector<4x1xf32>
      %254 = arith.subf %228, %253 : vector<4x1xf32>
      %255 = vector.broadcast %252 : vector<4x1xf32> to vector<4x256xf32>
      %256 = arith.mulf %175, %255 : vector<4x256xf32>
      %257 = vector.broadcast %254 : vector<4x1xf32> to vector<4x256xf32>
      %258 = arith.addf %256, %257 : vector<4x256xf32>
      %259 = vector.broadcast %252 : vector<4x1xf32> to vector<4x256xf32>
      %260 = arith.mulf %226, %259 : vector<4x256xf32>
      %261 = vector.broadcast %254 : vector<4x1xf32> to vector<4x256xf32>
      %262 = arith.addf %260, %261 : vector<4x256xf32>
      %263 = vector.extract_strided_slice %8 {offsets = [0, 0], sizes = [4, 1], strides = [1, 1]} : vector<4x4xf32> to vector<4x1xf32>
      %264 = vector.extract_strided_slice %258 {offsets = [0, 0], sizes = [1, 256], strides = [1, 1]} : vector<4x256xf32> to vector<1x256xf32>
      %265 = vector.broadcast %263 : vector<4x1xf32> to vector<4x256xf32>
      %266 = vector.broadcast %264 : vector<1x256xf32> to vector<4x256xf32>
      %267 = arith.mulf %265, %266 : vector<4x256xf32>
      %268 = vector.extract_strided_slice %8 {offsets = [0, 1], sizes = [4, 1], strides = [1, 1]} : vector<4x4xf32> to vector<4x1xf32>
      %269 = vector.extract_strided_slice %258 {offsets = [1, 0], sizes = [1, 256], strides = [1, 1]} : vector<4x256xf32> to vector<1x256xf32>
      %270 = vector.broadcast %268 : vector<4x1xf32> to vector<4x256xf32>
      %271 = vector.broadcast %269 : vector<1x256xf32> to vector<4x256xf32>
      %272 = arith.mulf %270, %271 : vector<4x256xf32>
      %273 = arith.addf %267, %272 : vector<4x256xf32>
      %274 = vector.extract_strided_slice %8 {offsets = [0, 2], sizes = [4, 1], strides = [1, 1]} : vector<4x4xf32> to vector<4x1xf32>
      %275 = vector.extract_strided_slice %258 {offsets = [2, 0], sizes = [1, 256], strides = [1, 1]} : vector<4x256xf32> to vector<1x256xf32>
      %276 = vector.broadcast %274 : vector<4x1xf32> to vector<4x256xf32>
      %277 = vector.broadcast %275 : vector<1x256xf32> to vector<4x256xf32>
      %278 = arith.mulf %276, %277 : vector<4x256xf32>
      %279 = arith.addf %273, %278 : vector<4x256xf32>
      %280 = vector.extract_strided_slice %8 {offsets = [0, 3], sizes = [4, 1], strides = [1, 1]} : vector<4x4xf32> to vector<4x1xf32>
      %281 = vector.extract_strided_slice %258 {offsets = [3, 0], sizes = [1, 256], strides = [1, 1]} : vector<4x256xf32> to vector<1x256xf32>
      %282 = vector.broadcast %280 : vector<4x1xf32> to vector<4x256xf32>
      %283 = vector.broadcast %281 : vector<1x256xf32> to vector<4x256xf32>
      %284 = arith.mulf %282, %283 : vector<4x256xf32>
      %285 = arith.addf %279, %284 : vector<4x256xf32>
      %286 = vector.extract_strided_slice %8 {offsets = [0, 0], sizes = [4, 1], strides = [1, 1]} : vector<4x4xf32> to vector<4x1xf32>
      %287 = vector.extract_strided_slice %262 {offsets = [0, 0], sizes = [1, 256], strides = [1, 1]} : vector<4x256xf32> to vector<1x256xf32>
      %288 = vector.broadcast %286 : vector<4x1xf32> to vector<4x256xf32>
      %289 = vector.broadcast %287 : vector<1x256xf32> to vector<4x256xf32>
      %290 = arith.mulf %288, %289 : vector<4x256xf32>
      %291 = vector.extract_strided_slice %8 {offsets = [0, 1], sizes = [4, 1], strides = [1, 1]} : vector<4x4xf32> to vector<4x1xf32>
      %292 = vector.extract_strided_slice %262 {offsets = [1, 0], sizes = [1, 256], strides = [1, 1]} : vector<4x256xf32> to vector<1x256xf32>
      %293 = vector.broadcast %291 : vector<4x1xf32> to vector<4x256xf32>
      %294 = vector.broadcast %292 : vector<1x256xf32> to vector<4x256xf32>
      %295 = arith.mulf %293, %294 : vector<4x256xf32>
      %296 = arith.addf %290, %295 : vector<4x256xf32>
      %297 = vector.extract_strided_slice %8 {offsets = [0, 2], sizes = [4, 1], strides = [1, 1]} : vector<4x4xf32> to vector<4x1xf32>
      %298 = vector.extract_strided_slice %262 {offsets = [2, 0], sizes = [1, 256], strides = [1, 1]} : vector<4x256xf32> to vector<1x256xf32>
      %299 = vector.broadcast %297 : vector<4x1xf32> to vector<4x256xf32>
      %300 = vector.broadcast %298 : vector<1x256xf32> to vector<4x256xf32>
      %301 = arith.mulf %299, %300 : vector<4x256xf32>
      %302 = arith.addf %296, %301 : vector<4x256xf32>
      %303 = vector.extract_strided_slice %8 {offsets = [0, 3], sizes = [4, 1], strides = [1, 1]} : vector<4x4xf32> to vector<4x1xf32>
      %304 = vector.extract_strided_slice %262 {offsets = [3, 0], sizes = [1, 256], strides = [1, 1]} : vector<4x256xf32> to vector<1x256xf32>
      %305 = vector.broadcast %303 : vector<4x1xf32> to vector<4x256xf32>
      %306 = vector.broadcast %304 : vector<1x256xf32> to vector<4x256xf32>
      %307 = arith.mulf %305, %306 : vector<4x256xf32>
      %308 = arith.addf %302, %307 : vector<4x256xf32>
      %309 = vector.extract_strided_slice %6 {offsets = [0, 21], sizes = [4, 1], strides = [1, 1]} : vector<4x23xf32> to vector<4x1xf32>
      %310 = vector.extract_strided_slice %6 {offsets = [0, 22], sizes = [4, 1], strides = [1, 1]} : vector<4x23xf32> to vector<4x1xf32>
      %cst_32 = arith.constant dense<0.000000e+00> : vector<4xf32>
      %311 = vector.multi_reduction <add>, %285, %cst_32 [1] : vector<4x256xf32> to vector<4xf32>
      %312 = vector.shape_cast %311 : vector<4xf32> to vector<4x1xf32>
      %cst_33 = arith.constant dense<0.000000e+00> : vector<4xf32>
      %313 = vector.multi_reduction <add>, %308, %cst_33 [1] : vector<4x256xf32> to vector<4xf32>
      %314 = vector.shape_cast %313 : vector<4xf32> to vector<4x1xf32>
      %315 = arith.addf %312, %314 : vector<4x1xf32>
      %cst_34 = arith.constant 0.001953125 : f32
      %316 = vector.broadcast %cst_34 : f32 to vector<4x1xf32>
      %317 = arith.mulf %315, %316 : vector<4x1xf32>
      %318 = vector.broadcast %317 : vector<4x1xf32> to vector<4x256xf32>
      %319 = arith.subf %285, %318 : vector<4x256xf32>
      %320 = arith.mulf %319, %319 : vector<4x256xf32>
      %cst_35 = arith.constant dense<0.000000e+00> : vector<4xf32>
      %321 = vector.multi_reduction <add>, %320, %cst_35 [1] : vector<4x256xf32> to vector<4xf32>
      %322 = vector.shape_cast %321 : vector<4xf32> to vector<4x1xf32>
      %323 = vector.broadcast %317 : vector<4x1xf32> to vector<4x256xf32>
      %324 = arith.subf %308, %323 : vector<4x256xf32>
      %325 = arith.mulf %324, %324 : vector<4x256xf32>
      %cst_36 = arith.constant dense<0.000000e+00> : vector<4xf32>
      %326 = vector.multi_reduction <add>, %325, %cst_36 [1] : vector<4x256xf32> to vector<4xf32>
      %327 = vector.shape_cast %326 : vector<4xf32> to vector<4x1xf32>
      %328 = arith.addf %322, %327 : vector<4x1xf32>
      %cst_37 = arith.constant 0.001953125 : f32
      %329 = vector.broadcast %cst_37 : f32 to vector<4x1xf32>
      %330 = arith.mulf %328, %329 : vector<4x1xf32>
      %cst_38 = arith.constant 9.99999974E-6 : f32
      %331 = vector.broadcast %cst_38 : f32 to vector<4x1xf32>
      %332 = arith.addf %330, %331 : vector<4x1xf32>
      %333 = math.rsqrt %332 : vector<4x1xf32>
      %334 = arith.mulf %309, %333 : vector<4x1xf32>
      %335 = arith.mulf %317, %334 : vector<4x1xf32>
      %336 = arith.subf %310, %335 : vector<4x1xf32>
      %337 = vector.broadcast %334 : vector<4x1xf32> to vector<4x256xf32>
      %338 = arith.mulf %285, %337 : vector<4x256xf32>
      %339 = vector.broadcast %336 : vector<4x1xf32> to vector<4x256xf32>
      %340 = arith.addf %338, %339 : vector<4x256xf32>
      %cst_39 = arith.constant 0.000000e+00 : f32
      %341 = vector.broadcast %cst_39 : f32 to vector<4x256xf32>
      %342 = arith.maximumf %340, %341 : vector<4x256xf32>
      %343 = vector.broadcast %334 : vector<4x1xf32> to vector<4x256xf32>
      %344 = arith.mulf %308, %343 : vector<4x256xf32>
      %345 = vector.broadcast %336 : vector<4x1xf32> to vector<4x256xf32>
      %346 = arith.addf %344, %345 : vector<4x256xf32>
      %cst_40 = arith.constant 0.000000e+00 : f32
      %347 = vector.broadcast %cst_40 : f32 to vector<4x256xf32>
      %348 = arith.maximumf %346, %347 : vector<4x256xf32>
      %c0_41 = arith.constant 0 : index
      %c0_42 = arith.constant 0 : index
      %c0_43 = arith.constant 0 : index
      %349 = vector.load %arg3[%c0_41, %c0_42, %c0_43] : memref<2x4x256xf32, #tpu.memory_space<vmem>>, vector<1x4x256xf32>
      %350 = vector.shape_cast %349 : vector<1x4x256xf32> to vector<4x256xf32>
      %351 = vector.shape_cast %342 : vector<4x256xf32> to vector<1x4x256xf32>
      tpu.vector_store %arg3[%c0_41, %c0_42, %c0_43], %351 {strides = array<i32>} : memref<2x4x256xf32, #tpu.memory_space<vmem>>, vector<1x4x256xf32>,
      %c1_44 = arith.constant 1 : index
      %c0_45 = arith.constant 0 : index
      %c0_46 = arith.constant 0 : index
      %352 = vector.load %arg3[%c1_44, %c0_45, %c0_46] : memref<2x4x256xf32, #tpu.memory_space<vmem>>, vector<1x4x256xf32>
      %353 = vector.shape_cast %352 : vector<1x4x256xf32> to vector<4x256xf32>
      %354 = vector.shape_cast %348 : vector<4x256xf32> to vector<1x4x256xf32>
      tpu.vector_store %arg3[%c1_44, %c0_45, %c0_46], %354 {strides = array<i32>} : memref<2x4x256xf32, #tpu.memory_space<vmem>>, vector<1x4x256xf32>,
    } else {
    }
    return
  }
  func.func @transform_0(%arg0: i32) -> (i32, i32, i32, i32) {
    %c0_i32 = arith.constant 0 : i32
    %c0_i32_0 = arith.constant 0 : i32
    %c0_i32_1 = arith.constant 0 : i32
    %c0_i32_2 = arith.constant 0 : i32
    return %c0_i32, %arg0, %c0_i32_0, %c0_i32_1 : i32, i32, i32, i32
  }
  func.func @transform_1(%arg0: i32) -> (i32, i32) {
    %c0_i32 = arith.constant 0 : i32
    %c0_i32_0 = arith.constant 0 : i32
    %c0_i32_1 = arith.constant 0 : i32
    return %c0_i32, %c0_i32_0 : i32, i32
  }
  func.func @transform_2(%arg0: i32) -> (i32, i32, i32) {
    %c0_i32 = arith.constant 0 : i32
    %c0_i32_0 = arith.constant 0 : i32
    %c0_i32_1 = arith.constant 0 : i32
    return %c0_i32, %c0_i32_0, %arg0 : i32, i32, i32
  }
}

</mosaic_0001>

<bundles_post_ra>
// kernel: tpu_custom_call.1
= control target key start
LH: loop header
LB: loop body
LE: loop exit
PB: predicated region body
PF: predicated region fallthrough
CT: control target
= control target key end

     0   :  { %7 = vsyncpa [#allocation3], 0  ;;  %s2534_s0 = inlined_call_operand.hbm [shape: f32[2,2,4,256], index: 0, kind: input, shape index: {}]   ;;  %s2535_s1 = inlined_call_operand.hbm [shape: f32[4,23], index: 1, kind: input, shape index: {}]   ;;  %s2536_s2 = inlined_call_operand.hbm [shape: f32[2,4,512], index: 2, kind: output, shape index: {}]  }
   0x1   :  { %9 = vsyncpa [#allocation3 + $0x1], 0 }
   0x2   :  { %10 = vsyncpa [#allocation6], 0 }
   0x3   :  { %11 = vsyncpa [#allocation4], 0 }
   0x4   :  { %13 = vsyncpa [#allocation4 + $0x1], 0  ;;  %s1797_s9 = smov 0   ;;  %s1799_s10 = smov 0  }
   0x5   :  { %s1801_s11 = smov 0   ;;  %s1803_s12 = smov 0  }
   0x6 LB: > { %s1818_s13 = sadd.s32 4294967295, %s1735_s12   ;;  %s1427_s14 = sadd.s32 4294967294, %s1735_s12   ;;  %s1735_s12 = sphi %s1803_s12, %s2560_s12   ;;  %s1731_s11 = sphi %s1801_s11, %s2559_s11   ;;  %s1727_s10 = sphi %s1799_s10, %s2558_s10   ;;  %s1723_s9 = sphi %s1797_s9, %s2557_s9  }
   0x7   : > { %s1822_s15 = sadd.s32 1, %s1735_s12   ;;  %s26_s16 = sadd.s32 1, %s1731_s11 }
   0x8   : > { %s23_s17 = ssub.s32 %s1735_s12, %s1822_s15  ;;  %p33_p0 = scmp.ne.s32.totalorder %s1731_s11, %s1727_s10 }
   0x9   : > { %p24_p1 = scmp.eq.s32.totalorder %s23_s17, 0  ;;  %p34_p2 = scmp.eq.s32.totalorder %s1735_s12, 0 }
   0xa   : > { %p39_p3 = scmp.ne.s32.totalorder %s1727_s10, %s1723_s9  ;;  %p2537_p4 = scmp.eq.s32.totalorder %s1818_s13, 0 }
   0xb   : > { %s1834_s18 = scalar_select %p24_p1, %s1731_s11, %s26_s16  }
   0xc   : > { %p1836_p5 = por %p34_p2, %p33_p0  ;;  %p1842_p6 = por %p2537_p4, %p39_p3 }
   0xd   : > { %p84_p7 = scmp.eq.s32.totalorder %s1818_s13, 1  ;;  %p90_p8 = scmp.eq.s32.totalorder %s1427_s14, 1 }
   0xe   : > { %s2542_s20 = scalar_select %p1842_p6, 1, 0 }
   0xf   : > { %p1428_p9 = scmp.ge.s32.totalorder %s1735_s12, 1  ;;  %p97_p10 = scmp.lt.s32.totalorder %s1735_s12, 3 }
  0x10   : > { %p1849_p11 = por %p84_p7, %p33_p0  ;;  %p1853_p12 = por %p90_p8, %p39_p3 }
  0x11   : > { %p1857_p13 = pnand %p1428_p9, %p97_p10  ;;  %s1737_s24 = smov [#allocation5]  }
  0x12   : > { %s2543_s21 = scalar_select %p1849_p11, 1, 0 }
  0x13   : > { %s2544_s22 = scalar_select %p1853_p12, 1, 0 }
  0x14   : > { %s2545_s23 = scalar_select %p1857_p13, 1, 0 }
  0x15   : > { %p1461_p4 = pneg %p1857_p13  ;;  %s110_s25 = sshll.u32 %s1737_s24, 4  ;;  %s111_s25 = int_to_ptr.vmem [resolvable:$true] %s110_s25 }
  0x16   : > { %p1474_p0 = scmp.lt.s32.totalorder %s1735_s12, 2  ;;  %p2546_p7 = scmp.eq.s32.totalorder %s1818_s13, 0 }
  0x17   : > { %s121_s27 = sand.u32 1, %s1731_s11   ;;  %s1624_s30 = scalar_lea.vmem %s111_s25, 64 }
  0x18   : > { %p1868_p6 = pnand %p1461_p4, %p2546_p7  ;;  %p1875_p3 = pnand %p1474_p0, %p1836_p5 }
  0x19   : > { %s1431_s29 = sshll.u32 %s121_s27, 4  ;;  %p1625_p9 = scmp.ne.s32.totalorder %s111_s25, %s1624_s30 }
  0x1a   : > { %p1615_p8 = pneg %p1868_p6  ;;  %p1632_p1 = scmp.lt.s32.totalorder %s111_s25, %s111_s25 }
  0x1b   : > { %p1633_p12 = scmp.lt.s32.totalorder %s1624_s30, %s1624_s30 }
  0x1c   : > { %p1627_p10 = pnand %p1625_p9, %p1615_p8 }
  0x1d   : > { %p1634_p4 = por %p1633_p12, %p1632_p1 }
  0x1e   : > { %p1628_p2 = pneg %p1627_p10 }
  0x20   : > { %p1635_p7 = pnand %p1634_p4, %p1628_p2 }
  0x22   : > { %1638 = shalt.err (!%p1635_p7)
}
  0x23   : > { %1464 = dma.hbm_to_vmem [thread:$0]  (!%p1868_p6), %s2535_s1, 64, %s111_s25, [#allocation6]  }
  0x24   : > { %s1451_s5 = sshll.u32 %s1735_s12, 7  ;;  %s125_s6 = scalar_lea.vmem [#allocation2], %s1431_s29 }
  0x25   : > { %s132_s7 = sshll.u32 %s125_s6, 4  ;;  %s1890_s16 = scalar_lea.hbm %s2534_s0, %s1451_s5  ;;  %s1892_s7 = int_to_ptr.vmem [resolvable:$true] %s132_s7 }
  0x26   : > { %s1894_s17 = scalar_lea.sflag [#allocation3], %s121_s27  ;;  %s1639_s19 = scalar_lea.hbm %s1890_s16, 256 }
  0x27   : > { %p1640_p5 = scmp.ne.s32.totalorder %s1890_s16, %s1639_s19  ;;  %p1641_p12 = pneg %p1875_p3 }
  0x28   : > { %s1644_s26 = scalar_lea.hbm %s2534_s0, 512  ;;  %p1645_p2 = scmp.lt.s32.totalorder %s1890_s16, %s2534_s0 }
  0x29   : > { %p1642_p6 = pnand %p1641_p12, %p1640_p5  ;;  %p1646_p0 = scmp.lt.s32.totalorder %s1644_s26, %s1639_s19 }
  0x2b   : > { %p1643_p1 = pneg %p1642_p6  ;;  %p1647_p8 = por %p1646_p0, %p1645_p2 }
  0x2d   : > { %p1648_p9 = pnand %p1647_p8, %p1643_p1 }
  0x2f   : > { %1651 = shalt.err (!%p1648_p9)
}
  0x30   : > { %s1652_s27 = scalar_lea.vmem %s1892_s7, 256  ;;  %s1738_s3 = smov [#allocation2]  }
  0x31   : > { %p1653_p10 = scmp.ne.s32.totalorder %s1892_s7, %s1652_s27  ;;  %s1657_s4 = sshll.u32 %s1738_s3, 4  ;;  %s1658_s4 = int_to_ptr.vmem [resolvable:$false] %s1657_s4 }
  0x32   : > { %s1659_s5 = scalar_lea.vmem %s1658_s4, 512  ;;  %p1660_p5 = scmp.lt.s32.totalorder %s1892_s7, %s1658_s4 }
  0x33   : > { %p1655_p4 = pnand %p1653_p10, %p1641_p12  ;;  %p1661_p6 = scmp.lt.s32.totalorder %s1659_s5, %s1652_s27 }
  0x35   : > { %p1656_p7 = pneg %p1655_p4  ;;  %p1662_p11 = por %p1661_p6, %p1660_p5 }
  0x37   : > { %p1663_p13 = pnand %p1662_p11, %p1656_p7 }
  0x39   : > { %1666 = shalt.err (!%p1663_p13)
}
  0x3a   : > { %s1739_s6 = smov 256   ;;  %s1740_s8 = smov 128  }
  0x3b   : > { %s1741_s14 = smov 8   ;;  %p2549_p12 = scmp.ne.s32.totalorder %s2545_s23, 0 }
  0x3c   : > { %1468 = dma.hbm_to_vmem [thread:$0]  (!%p1875_p3), %s1890_s16, 256, %s1892_s7, %s1894_s17, %s1739_s6, %s1740_s8, %s1741_s14  }
  0x3d   : > { %144 = sbr.rel (%p2549_p12) target bundleno = 2738 (0xab2), region = 28  ;;  %s1918_s19 = sand.u32 (!%p2549_p12), 1, %s1727_s10  }
  0x3e   : > { %s1435_s24 = sshll.u32 (!%p2549_p12), %s1918_s19, 4  ;;  %s147_s25 = scalar_lea.sflag (!%p2549_p12), [#allocation3], %s1918_s19 }
  0x3f   : > { %s1922_s26 = scalar_lea.vmem (!%p2549_p12), [#allocation2], %s1435_s24  ;;  %p2550_p11 = scmp.ne.s32.totalorder (!%p2549_p12), %s2542_s20, 0 }
  0x42   : > { %1710 = dma.done.wait (%p2550_p11), %s147_s25, 256  }
  0x43   : > { %1712 = vsyncadd (%p2550_p11), %s147_s25, 4294967040  ;;  %p2551_p13 = scmp.eq.s32.totalorder %s1818_s13, 0 }
  0x45   : > { %1714 = dma.done.wait (%p2551_p13), [#allocation6], 64   ;;  %p2552_p3 = pmov %p2551_p13 }
  0x46   : > { %s1932_s23 = scalar_lea.vmem [#allocation7], %s1435_s24  ;;  %p2553_p1 = scmp.ne.s32.totalorder %s1818_s13, 0 }
  0x47   : > { %1716 = vsyncadd (%p2552_p3), [#allocation6], 4294967232 }
  0x48   : > { %179 = sbr.rel (%p2553_p1) target bundleno = 79 (0x4f), region = 40 }
  0x4d   : > { %v180_v0 = vld [vmem:[%s1922_s26] sm:$0xff]  ;;  %v181_v1 = vld [vmem:[%s1922_s26 + $0x8] sm:$0xff] }
  0x4e   : > { %182 = vst [vmem:[%s1932_s23] sm:$0xff] %v180_v0  ;;  %183 = vst [vmem:[%s1932_s23 + $0x8] sm:$0xff] %v181_v1 }
  0x4f PF: > { %p1439_p2 = scmp.ne.s32.totalorder %s1818_s13, 1 }
  0x50   : > { %s1748_s20 = smov (!%p1439_p2), 1   ;;  %s1752_s28 = smov (!%p1439_p2), 113  }
  0x51   : > { %187 = sbr.rel (%p1439_p2) target bundleno = 2712 (0xa98), region = 44  ;;  %s1755_s7 = smov (!%p1439_p2), 127  }
  0x52   : > { %s1760_s16 = smov (!%p1439_p2), 15   ;;  %s1762_s17 = smov (!%p1439_p2), 17  }
  0x53   : > { %s1763_s29 = smov (!%p1439_p2), 111   ;;  %s1764_s30 = smov (!%p1439_p2), 126  }
  0x54   : > { %s1765_s27 = smov (!%p1439_p2), 110   ;;  %s1766_s3 = smov (!%p1439_p2), 112  }
  0x55   : > { %s1767_s4 = smov (!%p1439_p2), 95   ;;  %s1768_s5 = smov (!%p1439_p2), 96  }
  0x56   : > { %v1941_v2 = vld [vmem:[#allocation5] sm:$0xf]  ;;  %v1742_v3 = vmov 0   ;;  %v1743_v4 = vmov 2   ;;  %v1744_v5 = vmov 1   ;;  %v1745_v6 = vmov 3  }
  0x57   : > { %1552 = vset.pattern.permute.xlu0 %v1742_v3  ;;  %1554 = vset.pattern.permute.xlu1 %v1743_v4  ;;  %v192_v7 = vlaneseq  ;;  %v189_v11 = vld [vmem:[%s1922_s26] sm:$0xff]  ;;  %v1440_v12 = vld [vmem:[%s1922_s26 + $0x8] sm:$0xff]  ;;  %vm422_vm0 = vcmask 1043456   ;;  %vm545_vm5 = vcmask 924672   ;;  %vm637_vm6 = vcmask 7168   ;;  %s1769_s6 = smov 94  }
  0x58   : > { %233 = vperm.xlu0 %1552, %v1941_v2   ;;  %284 = vperm.xlu1 %1554, %v1941_v2   ;;  %vm674_vm7 = vcmask 121856   ;;  %vm523_vm8 = vcmask 1039360   ;;  %vm736_vm9 = vcmask 138240   ;;  %vm499_vm10 = vcmask 908288  }
  0x59   : > { %v238_v8 = vshrl.u32 %v192_v7, 7  ;;  %vm562_vm11 = vcmask 1031168   ;;  %vm598_vm12 = vcmask 916480   ;;  %vm654_vm13 = vcmask 900096  }
  0x5a   : > { %vm691_vm14 = vcmask 785408   ;;  %vm716_vm15 = vcmask 777216  }
  0x5b   : > { %v1948_v9 = vsub.s32 0, %v238_v8  ;;  %v243_v10 = vsub.s32 4, %v238_v8  ;;  %v1952_v13 = vsub.s32 2, %v238_v8  ;;  %v293_v14 = vsub.s32 6, %v238_v8 }
  0x5c   : > { %1553 = vset.pattern.permute.xlu0 %v1744_v5  ;;  %1555 = vset.pattern.permute.xlu1 %v1745_v6  ;;  %v1954_v15 = vsub.s32 1, %v238_v8  ;;  %v267_v16 = vsub.s32 5, %v238_v8  ;;  %v1956_v17 = vsub.s32 3, %v238_v8  ;;  %v319_v18 = vsub.s32 7, %v238_v8 }
  0x5d   : > { %258 = vperm.xlu0 %1553, %v1941_v2   ;;  %310 = vperm.xlu1 %1555, %v1941_v2   ;;  %v240_v19 = vrot.slane %v189_v11, %v1948_v9  ;;  %v244_v20 = vrot.slane %v189_v11, %v243_v10  ;;  %v339_v21 = vrot.slane %v1440_v12, %v1948_v9 }
  0x5e   : > { %v343_v22 = vrot.slane %v1440_v12, %v243_v10  ;;  %v290_v23 = vrot.slane %v189_v11, %v1952_v13  ;;  %v294_v24 = vrot.slane %v189_v11, %v293_v14  ;;  %v381_v25 = vrot.slane %v1440_v12, %v1952_v13 }
  0x5f   : > { %v385_v26 = vrot.slane %v1440_v12, %v293_v14  ;;  %v264_v27 = vrot.slane %v189_v11, %v1954_v15  ;;  %v268_v28 = vrot.slane %v189_v11, %v267_v16  ;;  %v359_v29 = vrot.slane %v1440_v12, %v1954_v15 }
  0x60   : > { %v363_v30 = vrot.slane %v1440_v12, %v267_v16  ;;  %v316_v31 = vrot.slane %v189_v11, %v1956_v17  ;;  %v320_v32 = vrot.slane %v189_v11, %v319_v18  ;;  %v403_v33 = vrot.slane %v1440_v12, %v1956_v17 }
  0x61   : > { %v407_v34 = vrot.slane %v1440_v12, %v319_v18  ;;  %v250_v35 = vrot.slane %v240_v19, %v1948_v9  ;;  %v254_v36 = vrot.slane %v244_v20, %v1948_v9  ;;  %v349_v37 = vrot.slane %v339_v21, %v1948_v9 }
  0x62   : > { %v353_v38 = vrot.slane %v343_v22, %v1948_v9  ;;  %v300_v41 = vrot.slane %v290_v23, %v1952_v13  ;;  %v304_v42 = vrot.slane %v294_v24, %v1952_v13  ;;  %v391_v43 = vrot.slane %v381_v25, %v1952_v13 }
  0x63   : > { %v395_v44 = vrot.slane %v385_v26, %v1952_v13  ;;  %v274_v45 = vrot.slane %v264_v27, %v1954_v15  ;;  %v278_v46 = vrot.slane %v268_v28, %v1954_v15  ;;  %v369_v47 = vrot.slane %v359_v29, %v1954_v15 }
  0x64   : > { %v373_v48 = vrot.slane %v363_v30, %v1954_v15  ;;  %v326_v49 = vrot.slane %v316_v31, %v1956_v17  ;;  %v330_v50 = vrot.slane %v320_v32, %v1956_v17  ;;  %v413_v51 = vrot.slane %v403_v33, %v1956_v17 }
  0x65   : > { %v417_v52 = vrot.slane %v407_v34, %v1956_v17 }
  0xd3   : > { %v234_v39 = vpop.permute.xlu0 %233  ;;  %v285_v40 = vpop.permute.xlu1 %284 }
  0xd4   : > { %v255_v53 = vmul.f32 %v250_v35, %v234_v39  ;;  %v256_v54 = vmul.f32 %v254_v36, %v234_v39  ;;  %v354_v55 = vmul.f32 %v349_v37, %v234_v39  ;;  %v355_v56 = vmul.f32 %v353_v38, %v234_v39 }
  0xd5   : > { %v305_v57 = vmul.f32 %v300_v41, %v285_v40  ;;  %v306_v58 = vmul.f32 %v304_v42, %v285_v40  ;;  %v396_v59 = vmul.f32 %v391_v43, %v285_v40  ;;  %v397_v60 = vmul.f32 %v395_v44, %v285_v40 }
  0xd8   : > { %v259_v61 = vpop.permute.xlu0 %258  ;;  %v311_v62 = vpop.permute.xlu1 %310 }
  0xd9   : > { %v279_v63 = vmul.f32 %v274_v45, %v259_v61  ;;  %v280_v0 = vmul.f32 %v278_v46, %v259_v61  ;;  %v374_v1 = vmul.f32 %v369_v47, %v259_v61  ;;  %v375_v3 = vmul.f32 %v373_v48, %v259_v61 }
  0xda   : > { %v331_v4 = vmul.f32 %v326_v49, %v311_v62  ;;  %v332_v5 = vmul.f32 %v330_v50, %v311_v62  ;;  %v418_v6 = vmul.f32 %v413_v51, %v311_v62  ;;  %v419_v8 = vmul.f32 %v417_v52, %v311_v62 }
  0xdb   : > { %v281_v10 = vadd.f32 %v279_v63, %v255_v53  ;;  %v282_v11 = vadd.f32 %v280_v0, %v256_v54  ;;  %v376_v12 = vadd.f32 %v374_v1, %v354_v55  ;;  %v377_v14 = vadd.f32 %v375_v3, %v355_v56 }
  0xdc   : > { %v1746_v49 = vmov 17   ;;  %v1747_v50 = vmov 9   ;;  %v193_v56 = vand.u32 127, %v192_v7  ;;  %v1749_v63 = vmov 0.0  }
  0xdd   : > { %v398_v16 = vadd.f32 %v396_v59, %v376_v12  ;;  %v399_v18 = vadd.f32 %v397_v60, %v377_v14  ;;  %v307_v19 = vadd.f32 %v305_v57, %v281_v10  ;;  %v308_v20 = vadd.f32 %v306_v58, %v282_v11  ;;  %1556 = vset.pattern.permute.xlu1 %v1746_v49 }
  0xde   : > { %1557 = vset.pattern.permute.xlu0 %v1747_v50  ;;  %v194_v57 = vadd.s32 128, %v193_v56  ;;  %v199_v60 = vand.u32 15, %v193_v56  ;;  %v1750_v3 = vmov 10   ;;  %v1754_v10 = vmov 12  }
  0xdf   : > { %v1982_v21 = vadd.f32 %v418_v6, %v398_v16  ;;  %v1984_v22 = vadd.f32 %v419_v8, %v399_v18  ;;  %v1986_v23 = vadd.f32 %v331_v4, %v307_v19  ;;  %v1988_v24 = vadd.f32 %v332_v5, %v308_v20 }
  0xe0   : > { %v206_v61 = vand.u32 15, %v194_v57  ;;  %vm225_vm1 = vcmp.le.s32.totalorder %v199_v60, 14  ;;  %v1751_v4 = vmov 11   ;;  %vm219_vm3 = vcmp.ge.s32.totalorder %v199_v60, 1 }
  0xe1   : > { %v428_v25 = vsel %vm422_vm0, %v1982_v21, 0.0  ;;  %v429_v26 = vsel %vm422_vm0, %v1984_v22, 0.0  ;;  %v423_v27 = vsel %vm422_vm0, %v1986_v23, 0.0  ;;  %v424_v28 = vsel %vm422_vm0, %v1988_v24, 0.0 }
  0xe2   : > { %v430_v29 = vadd.f32 %v429_v26, %v428_v25  ;;  %v425_v30 = vadd.f32 %v424_v28, %v423_v27  ;;  %vm226_vm2 = vcmp.le.s32.totalorder %v206_v61, 14  ;;  %v1443_v0 = vsel %vm225_vm1, 1.0, %v1749_v63 }
  0xe3   : > { %v1444_v1 = vsel %vm226_vm2, 1.0, %v1749_v63  ;;  %vm220_vm4 = vcmp.ge.s32.totalorder %v206_v61, 1  ;;  %v1753_v5 = vmov 13   ;;  %v1441_v6 = vsel %vm219_vm3, 1.0, %v1749_v63 }
  0xe4   : > { %431 = vadd.xlane.f32.xlu0 %v430_v29  ;;  %426 = vadd.xlane.f32.xlu1 %v425_v30  ;;  %v1560_v7 = vpack.i.bf16 %v1444_v1, %v1443_v0  ;;  %v1442_v8 = vsel %vm220_vm4, 1.0, %v1749_v63  ;;  %v1756_v12 = vmov 16   ;;  %v1757_v14 = vmov 14  }
  0xe5   : > { %v1567_v11 = vpack.i.bf16 %v1442_v8, %v1441_v6  ;;  %v1758_v16 = vmov 8   ;;  %v1759_v18 = vmov 15   ;;  %v1761_v19 = vmov 18  }
  0xe6   : > { %vm753_vm1 = vcmask 769024  }
 0x16d   : > { %v432_v31 = vpop.xlane.xlu0 %431  ;;  %v427_v32 = vpop.xlane.xlu1 %426 }
 0x16e   : > { %v433_v33 = vadd.f32 %v432_v31, %v427_v32 }
 0x170   : > { %v434_v34 = vmul.f32 0.001953125, %v433_v33 }
 0x172   : > { %v444_v35 = vsub.f32 %v1982_v21, %v434_v34  ;;  %v445_v36 = vsub.f32 %v1984_v22, %v434_v34  ;;  %v435_v37 = vsub.f32 %v1986_v23, %v434_v34  ;;  %v436_v38 = vsub.f32 %v1988_v24, %v434_v34 }
 0x174   : > { %v446_v39 = vmul.f32 %v444_v35, %v444_v35  ;;  %v447_v40 = vmul.f32 %v445_v36, %v445_v36  ;;  %v437_v41 = vmul.f32 %v435_v37, %v435_v37  ;;  %v438_v42 = vmul.f32 %v436_v38, %v436_v38 }
 0x176   : > { %v448_v43 = vsel %vm422_vm0, %v446_v39, 0.0  ;;  %v449_v44 = vsel %vm422_vm0, %v447_v40, 0.0  ;;  %v439_v45 = vsel %vm422_vm0, %v437_v41, 0.0  ;;  %v440_v46 = vsel %vm422_vm0, %v438_v42, 0.0 }
 0x177   : > { %v450_v47 = vadd.f32 %v449_v44, %v448_v43  ;;  %v441_v48 = vadd.f32 %v440_v46, %v439_v45 }
 0x179   : > { %451 = vadd.xlane.f32.xlu1 %v450_v47  ;;  %442 = vadd.xlane.f32.xlu0 %v441_v48 }
 0x202   : > { %v452_v51 = vpop.xlane.xlu1 %451  ;;  %v443_v52 = vpop.xlane.xlu0 %442 }
 0x203   : > { %v453_v53 = vadd.f32 %v452_v51, %v443_v52 }
 0x205   : > { %v454_v54 = vmul.f32 0.001953125, %v453_v53 }
 0x207   : > { %v455_v55 = vadd.f32 1e-05, %v454_v54 }
 0x209   : > { %1606 = vrsqrt.f32 %v455_v55 }
 0x216   : > { %v1607_v58 = vpop.eup %1606 }
 0x217   : > { %v457_v59 = vmul.f32 %v1607_v58, %v1941_v2 }
 0x219   : > { %466 = vperm.xlu1 %1556, %v457_v59   ;;  %v458_v62 = vmul.f32 %v457_v59, %v434_v34 }
 0x21b   : > { %460 = vrot.lane.b32.xlu0 %v458_v62, %s1748_s20 }
 0x21d   : > { %1558 = vset.pattern.permute.xlu1 %v1750_v3 }
 0x21e   : > { %533 = vperm.xlu1 %1558, %v1941_v2  }
 0x21f   : > { %508 = vperm.xlu0 %1557, %v1941_v2  }
 0x222   : > { %1559 = vset.pattern.permute.xlu1 %v1751_v4 }
 0x223   : > { %572 = vperm.xlu1 %1559, %v1941_v2   ;;  %1561 = vrot.lane.b32.xlu0 %v1560_v7, %s1752_s28 }
 0x224   : > { %1566 = vset.pattern.permute.xlu0 %v1753_v5 }
 0x227   : > { %1565 = vset.pattern.permute.xlu1 %v1754_v10  ;;  %627 = vperm.xlu0 %1566, %v1941_v2  }
 0x228   : > { %608 = vperm.xlu1 %1565, %v1941_v2  }
 0x22b   : > { %1574 = vrot.lane.b32.xlu0 %v1560_v7, %s1748_s20 }
 0x22c   : > { %1568 = vrot.lane.b32.xlu1 %v1567_v11, %s1755_s7  ;;  %1579 = vset.pattern.permute.xlu0 %v1756_v12 }
 0x22d   : > { %1572 = vset.pattern.permute.xlu1 %v1757_v14 }
 0x22f   : > { %726 = vperm.xlu0 %1579, %v1941_v2  }
 0x230   : > { %664 = vperm.xlu1 %1572, %v1941_v2  }
 0x233   : > { %1590 = vset.pattern.permute.xlu0 %v1758_v16 }
 0x234   : > { %1578 = vset.pattern.permute.xlu1 %v1759_v18  ;;  %487 = vperm.xlu0 %1590, %v1941_v2  }
 0x235   : > { %701 = vperm.xlu1 %1578, %v1941_v2  }
 0x239   : > { %1581 = vrot.lane.b32.xlu1 %v1567_v11, %s1760_s16 }
 0x23a   : > { %1591 = vset.pattern.permute.xlu1 %v1761_v19 }
 0x23d   : > { %1586 = vrot.lane.b32.xlu1 %v1560_v7, %s1762_s17 }
 0x28d   : > { %v461_v20 = vpop.permute.xlu0 %460 }
 0x28e   : > { %v463_v25 = vsub.f32 %v1941_v2, %v461_v20 }
 0x290   : > { %473 = vperm.xlu1 %1591, %v463_v25  }
 0x294   : > { %1593 = vrot.lane.b32.xlu1 %v1567_v11, %s1763_s29  ;;  %v467_v26 = vpop.permute.xlu1 %466 }
 0x295   : > { %v469_v62 = vmul.f32 %v467_v26, %v1986_v23  ;;  %v470_v63 = vmul.f32 %v467_v26, %v1988_v24  ;;  %v480_v0 = vmul.f32 %v467_v26, %v1982_v21  ;;  %v481_v1 = vmul.f32 %v467_v26, %v1984_v22 }
 0x299   : > { %v2023_v27 = vpop.permute.xlu1 %533 }
 0x29a   : > { %v2025_v28 = vpop.permute.xlu0 %508  ;;  %v536_v30 = vmul.f32 0.0, %v2023_v27 }
 0x29b   : > { %v511_v29 = vmul.f32 0.0, %v2025_v28 }
 0x29d   : > { %517 = vrot.lane.b32.xlu1 %v511_v29, %s1755_s7 }
 0x29e   : > { %v2030_v31 = vpop.permute.xlu1 %572  ;;  %v1562_v32 = vpop.permute.xlu0 %1561 }
 0x29f   : > { %v2032_v2 = vunpack.i.h.bf16 %v1562_v32  ;;  %v1563_v33 = vunpack.i.l.bf16 %v1562_v32  ;;  %v575_v39 = vmul.f32 0.0, %v2030_v31 }
 0x2a1   : > { %v550_v34 = vmul.f32 %v1563_v33, %v536_v30  ;;  %v2035_v35 = vsel %vm545_vm5, %v1563_v33, %v2032_v2 }
 0x2a2   : > { %v2037_v36 = vpop.permute.xlu0 %627 }
 0x2a3   : > { %v2039_v37 = vpop.permute.xlu1 %608  ;;  %556 = vrot.lane.b32.xlu0 %v550_v34, %s1764_s30  ;;  %v632_v38 = vmul.f32 0.0, %v2037_v36 }
 0x2a6   : > { %v1575_v40 = vpop.permute.xlu0 %1574 }
 0x2a7   : > { %v2044_v41 = vpop.permute.xlu1 %1568  ;;  %v1577_v42 = vunpack.i.h.bf16 %v1575_v40  ;;  %v2046_v43 = vunpack.i.l.bf16 %v1575_v40 }
 0x2a8   : > { %v1570_v44 = vunpack.i.l.bf16 %v2044_v41 }
 0x2a9   : > { %v644_v45 = vmul.f32 %v1577_v42, %v632_v38  ;;  %v2050_v46 = vsel %vm637_vm6, %v2046_v43, %v1577_v42  ;;  %v1571_v38 = vunpack.i.h.bf16 %v2044_v41 }
 0x2aa   : > { %v586_v47 = vmul.f32 %v1570_v44, %v575_v39  ;;  %v2060_v53 = vpop.permute.xlu0 %726 }
 0x2ab   : > { %v2054_v48 = vpop.permute.xlu1 %664  ;;  %652 = vrot.lane.b32.xlu0 %v644_v45, %s1765_s27  ;;  %v731_v57 = vmul.f32 0.0, %v2060_v53 }
 0x2ac   : > { %592 = vrot.lane.b32.xlu1 %v586_v47, %s1766_s3  ;;  %v669_v51 = vmul.f32 0.0, %v2054_v48 }
 0x2b0   : > { %v702_v49 = vpop.permute.xlu1 %701 }
 0x2b1   : > { %v706_v50 = vmul.f32 0.0, %v702_v49 }
 0x2b3   : > { %714 = vrot.lane.b32.xlu0 %v706_v50, %s1767_s4 }
 0x2b4   : > { %v1582_v52 = vpop.permute.xlu1 %1581 }
 0x2b5   : > { %v1584_v54 = vunpack.i.h.bf16 %v1582_v52  ;;  %v2062_v55 = vunpack.i.l.bf16 %v1582_v52 }
 0x2b7   : > { %v681_v56 = vmul.f32 %v1584_v54, %v669_v51  ;;  %v2066_v58 = vsel %vm674_vm7, %v2062_v55, %v1584_v54 }
 0x2b8   : > { %v2068_v59 = vpop.permute.xlu1 %1586 }
 0x2b9   : > { %v1589_v60 = vunpack.i.h.bf16 %v2068_v59  ;;  %689 = vrot.lane.b32.xlu1 %v681_v56, %s1768_s5 }
 0x2bb   : > { %v743_v61 = vmul.f32 %v1589_v60, %v731_v57 }
 0x2bd   : > { %751 = vrot.lane.b32.xlu1 %v743_v61, %s1769_s6 }
 0x30b   : > { %v474_v3 = vpop.permute.xlu1 %473 }
 0x30c   : > { %v476_v7 = vadd.f32 %v474_v3, %v469_v62  ;;  %v477_v4 = vadd.f32 %v474_v3, %v470_v63  ;;  %v482_v5 = vadd.f32 %v480_v0, %v474_v3  ;;  %v483_v6 = vadd.f32 %v481_v1, %v474_v3 }
 0x30e   : > { %v2079_v8 = vmax.f32 %v476_v7, 0.0  ;;  %v2081_v10 = vmax.f32 %v477_v4, 0.0  ;;  %v2083_v11 = vmax.f32 %v482_v5, 0.0  ;;  %v2085_v12 = vmax.f32 %v483_v6, 0.0 }
 0x310   : > { %v513_v23 = vmul.f32 %v2025_v28, %v2081_v10  ;;  %v512_v21 = vmul.f32 %v2025_v28, %v2079_v8  ;;  %v767_v22 = vmul.f32 %v2025_v28, %v2085_v12  ;;  %v766_v24 = vmul.f32 %v2025_v28, %v2083_v11 }
 0x311   : > { %v612_v14 = vmul.f32 %v2039_v37, %v2081_v10  ;;  %v611_v16 = vmul.f32 %v2039_v37, %v2079_v8  ;;  %v819_v18 = vmul.f32 %v2039_v37, %v2085_v12  ;;  %v818_v19 = vmul.f32 %v2039_v37, %v2083_v11 }
 0x312   : > { %521 = vrot.lane.b32.xlu1 %v513_v23, %s1755_s7  ;;  %519 = vrot.lane.b32.xlu0 %v512_v21, %s1755_s7  ;;  %v705_v20 = vmul.f32 %v702_v49, %v2081_v10  ;;  %v704_v25 = vmul.f32 %v702_v49, %v2079_v8  ;;  %v869_v26 = vmul.f32 %v702_v49, %v2083_v11 }
 0x313   : > { %v870_v28 = vmul.f32 %v702_v49, %v2085_v12  ;;  %v538_v29 = vmul.f32 %v2023_v27, %v2081_v10  ;;  %v537_v30 = vmul.f32 %v2023_v27, %v2079_v8  ;;  %v783_v34 = vmul.f32 %v2023_v27, %v2085_v12 }
 0x314   : > { %v782_v37 = vmul.f32 %v2023_v27, %v2083_v11  ;;  %v576_v42 = vmul.f32 %v2030_v31, %v2079_v8  ;;  %v577_v45 = vmul.f32 %v2030_v31, %v2081_v10  ;;  %v582_v27 = vsel %vm523_vm8, %v1570_v44, %v1571_v38 }
 0x315   : > { %v552_v32 = vmul.f32 %v2032_v2, %v538_v29  ;;  %v551_v33 = vmul.f32 %v2035_v35, %v537_v30  ;;  %v785_v39 = vmul.f32 %v2032_v2, %v783_v34  ;;  %v800_v2 = vmul.f32 %v2030_v31, %v2083_v11 }
 0x316   : > { %772 = vrot.lane.b32.xlu1 %v767_v22, %s1755_s7  ;;  %770 = vrot.lane.b32.xlu0 %v766_v24, %s1755_s7  ;;  %v784_v40 = vmul.f32 %v782_v37, %v2035_v35  ;;  %v587_v47 = vmul.f32 %v582_v27, %v576_v42  ;;  %v588_v49 = vmul.f32 %v1571_v38, %v577_v45  ;;  %v488_v24 = vpop.permute.xlu0 %487 }
 0x317   : > { %v801_v35 = vmul.f32 %v2030_v31, %v2085_v12  ;;  %v802_v50 = vmul.f32 %v800_v2, %v582_v27  ;;  %v630_v52 = vmul.f32 %v2037_v36, %v2079_v8  ;;  %v631_v41 = vmul.f32 %v2037_v36, %v2081_v10 }
 0x318   : > { %v834_v54 = vmul.f32 %v2037_v36, %v2085_v12  ;;  %v833_v56 = vmul.f32 %v2037_v36, %v2083_v11  ;;  %v668_v62 = vmul.f32 %v2054_v48, %v2081_v10  ;;  %v667_v63 = vmul.f32 %v2054_v48, %v2079_v8 }
 0x319   : > { %v803_v51 = vmul.f32 %v1571_v38, %v801_v35  ;;  %v642_v44 = vmul.f32 %v2046_v43, %v630_v52  ;;  %v643_v31 = vmul.f32 %v2050_v46, %v631_v41  ;;  %v851_v1 = vmul.f32 %v2054_v48, %v2083_v11 }
 0x31a   : > { %617 = vrot.lane.b32.xlu1 %v612_v14, %s1763_s29  ;;  %615 = vrot.lane.b32.xlu0 %v611_v16, %s1763_s29  ;;  %v836_v57 = vmul.f32 %v834_v54, %v2050_v46  ;;  %v835_v61 = vmul.f32 %v2046_v43, %v833_v56  ;;  %v680_v36 = vmul.f32 %v2066_v58, %v668_v62  ;;  %v1588_v46 = vunpack.i.l.bf16 %v2068_v59  ;;  %v1594_v59 = vpop.permute.xlu1 %1593  ;;  %v557_v14 = vpop.permute.xlu0 %556 }
 0x31b   : > { %v679_v0 = vmul.f32 %v2062_v55, %v667_v63  ;;  %v852_v43 = vmul.f32 %v2054_v48, %v2085_v12  ;;  %v853_v3 = vmul.f32 %v2062_v55, %v851_v1  ;;  %v730_v4 = vmul.f32 %v2060_v53, %v2081_v10 }
 0x31c   : > { %v729_v5 = vmul.f32 %v2060_v53, %v2079_v8  ;;  %v737_v48 = vsel %vm736_vm9, %v1588_v46, %v1589_v60  ;;  %v885_v55 = vmul.f32 %v2060_v53, %v2083_v11  ;;  %v763_v2 = vmul.f32 %v488_v24, %v2085_v12 }
 0x31d   : > { %v854_v7 = vmul.f32 %v852_v43, %v2066_v58  ;;  %v742_v6 = vmul.f32 %v737_v48, %v730_v4  ;;  %v886_v58 = vmul.f32 %v2060_v53, %v2085_v12  ;;  %v1595_v35 = vunpack.i.l.bf16 %v1594_v59 }
 0x31e   : > { %824 = vrot.lane.b32.xlu1 %v819_v18, %s1763_s29  ;;  %822 = vrot.lane.b32.xlu0 %v818_v19, %s1763_s29  ;;  %v741_v23 = vmul.f32 %v1588_v46, %v729_v5  ;;  %v887_v21 = vmul.f32 %v1588_v46, %v885_v55  ;;  %v518_v60 = vpop.permute.xlu1 %517  ;;  %v2201_v18 = vpop.permute.xlu0 %652  ;;  %v492_v52 = vmul.f32 %v488_v24, %v2081_v10  ;;  %v490_v62 = vmul.f32 0.0, %v488_v24 }
 0x31f   : > { %v888_v22 = vmul.f32 %v886_v58, %v737_v48  ;;  %v491_v41 = vmul.f32 %v488_v24, %v2079_v8  ;;  %v762_v12 = vmul.f32 %v488_v24, %v2083_v11 }
 0x320   : > { %v504_v5 = vmul.f32 %v1595_v35, %v490_v62 }
 0x322   : > { %712 = vrot.lane.b32.xlu1 %v705_v20, %s1767_s4  ;;  %710 = vrot.lane.b32.xlu0 %v704_v25, %s1767_s4  ;;  %v2199_v16 = vpop.permute.xlu1 %592 }
 0x325   : > { %v2205_v53 = vpop.permute.xlu0 %714 }
 0x326   : > { %873 = vrot.lane.b32.xlu1 %v869_v26, %s1767_s4  ;;  %875 = vrot.lane.b32.xlu0 %v870_v28, %s1767_s4 }
 0x32a   : > { %560 = vrot.lane.b32.xlu0 %v552_v32, %s1764_s30  ;;  %558 = vrot.lane.b32.xlu1 %v551_v33, %s1764_s30 }
 0x32b   : > { %v2203_v19 = vpop.permute.xlu1 %689 }
 0x32e   : > { %790 = vrot.lane.b32.xlu0 %v785_v39, %s1764_s30  ;;  %788 = vrot.lane.b32.xlu1 %v784_v40, %s1764_s30 }
 0x32f   : > { %v2207_v20 = vpop.permute.xlu1 %751 }
 0x332   : > { %594 = vrot.lane.b32.xlu0 %v587_v47, %s1766_s3  ;;  %596 = vrot.lane.b32.xlu1 %v588_v49, %s1766_s3  ;;  %v1596_v49 = vunpack.i.h.bf16 %v1594_v59 }
 0x336   : > { %806 = vrot.lane.b32.xlu0 %v802_v50, %s1766_s3  ;;  %808 = vrot.lane.b32.xlu1 %v803_v51, %s1766_s3 }
 0x33a   : > { %648 = vrot.lane.b32.xlu0 %v642_v44, %s1765_s27  ;;  %650 = vrot.lane.b32.xlu1 %v643_v31, %s1765_s27  ;;  %v765_v44 = vmul.f32 %v1596_v49, %v763_v2  ;;  %v500_v31 = vsel %vm499_vm10, %v1595_v35, %v1596_v49 }
 0x33b   : > { %v764_v48 = vmul.f32 %v762_v12, %v500_v31 }
 0x33e   : > { %841 = vrot.lane.b32.xlu0 %v836_v57, %s1765_s27  ;;  %839 = vrot.lane.b32.xlu1 %v835_v61, %s1765_s27  ;;  %v506_v61 = vmul.f32 %v1596_v49, %v492_v52 }
 0x342   : > { %687 = vrot.lane.b32.xlu0 %v680_v36, %s1768_s5  ;;  %685 = vrot.lane.b32.xlu1 %v679_v0, %s1768_s5  ;;  %v505_v36 = vmul.f32 %v500_v31, %v491_v41 }
 0x346   : > { %857 = vrot.lane.b32.xlu0 %v853_v3, %s1768_s5  ;;  %859 = vrot.lane.b32.xlu1 %v854_v7, %s1768_s5 }
 0x34a   : > { %749 = vrot.lane.b32.xlu0 %v742_v6, %s1769_s6  ;;  %747 = vrot.lane.b32.xlu1 %v741_v23, %s1769_s6 }
 0x34e   : > { %891 = vrot.lane.b32.xlu0 %v887_v21, %s1769_s6  ;;  %893 = vrot.lane.b32.xlu1 %v888_v22, %s1769_s6 }
 0x384   : > { %v522_v25 = vpop.permute.xlu1 %521  ;;  %v520_v26 = vpop.permute.xlu0 %519 }
 0x385   : > { %v525_v63 = vsel %vm523_vm8, %v520_v26, %v522_v25  ;;  %v531_v1 = vadd.f32 %v522_v25, %v506_v61  ;;  %v524_v8 = vsel %vm523_vm8, %v518_v60, %v520_v26 }
 0x386   : > { %v530_v43 = vadd.f32 %v525_v63, %v505_v36  ;;  %v529_v58 = vadd.f32 %v524_v8, %v504_v5 }
 0x388   : > { %v773_v28 = vpop.permute.xlu1 %772  ;;  %v771_v29 = vpop.permute.xlu0 %770 }
 0x389   : > { %v781_v54 = vadd.f32 %v773_v28, %v765_v44  ;;  %v774_v46 = vsel %vm523_vm8, %v518_v60, %v771_v29  ;;  %v775_v21 = vsel %vm523_vm8, %v771_v29, %v773_v28 }
 0x38a   : > { %v779_v22 = vadd.f32 %v774_v46, %v504_v5  ;;  %v780_v28 = vadd.f32 %v775_v21, %v764_v48 }
 0x38c   : > { %v2209_v30 = vpop.permute.xlu1 %617  ;;  %v2211_v32 = vpop.permute.xlu0 %615 }
 0x390   : > { %v2213_v33 = vpop.permute.xlu1 %824  ;;  %v2215_v34 = vpop.permute.xlu0 %822 }
 0x394   : > { %v2217_v37 = vpop.permute.xlu1 %712  ;;  %v2219_v38 = vpop.permute.xlu0 %710 }
 0x398   : > { %v2221_v39 = vpop.permute.xlu1 %873  ;;  %v2223_v40 = vpop.permute.xlu0 %875 }
 0x39c   : > { %v561_v42 = vpop.permute.xlu0 %560  ;;  %v559_v45 = vpop.permute.xlu1 %558 }
 0x39d   : > { %v564_v10 = vsel %vm562_vm11, %v559_v45, %v561_v42  ;;  %v570_v23 = vadd.f32 %v561_v42, %v531_v1  ;;  %v563_v59 = vsel %vm562_vm11, %v557_v14, %v559_v45 }
 0x39e   : > { %v569_v11 = vadd.f32 %v564_v10, %v530_v43  ;;  %v568_v29 = vadd.f32 %v563_v59, %v529_v58  ;;  %v826_v43 = vsel %vm499_vm10, %v2215_v34, %v2213_v33 }
 0x3a0   : > { %v791_v27 = vpop.permute.xlu0 %790  ;;  %v789_v47 = vpop.permute.xlu1 %788 }
 0x3a1   : > { %v799_v0 = vadd.f32 %v791_v27, %v781_v54  ;;  %v792_v55 = vsel %vm562_vm11, %v557_v14, %v789_v47  ;;  %v793_v14 = vsel %vm562_vm11, %v789_v47, %v791_v27 }
 0x3a2   : > { %v797_v42 = vadd.f32 %v792_v55, %v779_v22  ;;  %v798_v27 = vadd.f32 %v793_v14, %v780_v28 }
 0x3a4   : > { %v595_v50 = vpop.permute.xlu0 %594  ;;  %v597_v51 = vpop.permute.xlu1 %596 }
 0x3a5   : > { %v600_v6 = vsel %vm598_vm12, %v595_v50, %v597_v51  ;;  %v606_v60 = vadd.f32 %v597_v51, %v570_v23  ;;  %v599_v35 = vsel %vm598_vm12, %v2199_v16, %v595_v50  ;;  %v619_v51 = vsel %vm499_vm10, %v2211_v32, %v2209_v30 }
 0x3a6   : > { %v605_v24 = vadd.f32 %v600_v6, %v569_v11  ;;  %v878_v6 = vsel %vm716_vm15, %v2223_v40, %v2205_v53 }
 0x3a7   : > { %v625_v50 = vadd.f32 %v2209_v30, %v606_v60 }
 0x3a8   : > { %v807_v56 = vpop.permute.xlu0 %806  ;;  %v809_v57 = vpop.permute.xlu1 %808  ;;  %v624_v61 = vadd.f32 %v619_v51, %v605_v24 }
 0x3a9   : > { %v817_v3 = vadd.f32 %v809_v57, %v799_v0  ;;  %v810_v25 = vsel %vm598_vm12, %v2199_v16, %v807_v56  ;;  %v604_v16 = vadd.f32 %v599_v35, %v568_v29  ;;  %v811_v54 = vsel %vm598_vm12, %v807_v56, %v809_v57 }
 0x3aa   : > { %v815_v41 = vadd.f32 %v810_v25, %v797_v42  ;;  %v816_v1 = vadd.f32 %v811_v54, %v798_v27 }
 0x3ab   : > { %v832_v26 = vadd.f32 %v2213_v33, %v817_v3  ;;  %v623_v10 = vadd.f32 %v2211_v32, %v604_v16  ;;  %v717_v32 = vsel %vm716_vm15, %v2219_v38, %v2217_v37 }
 0x3ac   : > { %v649_v7 = vpop.permute.xlu0 %648  ;;  %v651_v4 = vpop.permute.xlu1 %650  ;;  %v831_v33 = vadd.f32 %v826_v43, %v816_v1 }
 0x3ad   : > { %v655_v44 = vsel %vm654_vm13, %v649_v7, %v651_v4  ;;  %v656_v31 = vsel %vm654_vm13, %v651_v4, %v2201_v18  ;;  %v718_v4 = vsel %vm716_vm15, %v2217_v37, %v2205_v53  ;;  %v660_v5 = vadd.f32 %v649_v7, %v623_v10 }
 0x3ae   : > { %v661_v36 = vadd.f32 %v655_v44, %v624_v61  ;;  %v662_v0 = vadd.f32 %v656_v31, %v625_v50 }
 0x3b0   : > { %v842_v49 = vpop.permute.xlu0 %841  ;;  %v840_v2 = vpop.permute.xlu1 %839 }
 0x3b1   : > { %v844_v52 = vsel %vm654_vm13, %v842_v49, %v2201_v18  ;;  %v830_v18 = vadd.f32 %v2215_v34, %v815_v41  ;;  %v843_v34 = vsel %vm654_vm13, %v840_v2, %v842_v49 }
 0x3b2   : > { %v850_v45 = vadd.f32 %v844_v52, %v832_v26  ;;  %v849_v24 = vadd.f32 %v843_v34, %v831_v33 }
 0x3b3   : > { %v848_v46 = vadd.f32 %v840_v2, %v830_v18 }
 0x3b4   : > { %v688_v62 = vpop.permute.xlu0 %687  ;;  %v686_v63 = vpop.permute.xlu1 %685 }
 0x3b5   : > { %v693_v47 = vsel %vm691_vm14, %v688_v62, %v2203_v19  ;;  %v692_v12 = vsel %vm691_vm14, %v686_v63, %v688_v62 }
 0x3b6   : > { %v699_v30 = vadd.f32 %v693_v47, %v662_v0  ;;  %v698_v8 = vadd.f32 %v692_v12, %v661_v36 }
 0x3b8   : > { %v858_v56 = vpop.permute.xlu0 %857  ;;  %v860_v57 = vpop.permute.xlu1 %859  ;;  %v724_v55 = vadd.f32 %v718_v4, %v699_v30  ;;  %v723_v58 = vadd.f32 %v717_v32, %v698_v8 }
 0x3b9   : > { %v862_v3 = vsel %vm691_vm14, %v860_v57, %v2203_v19  ;;  %v866_v23 = vadd.f32 %v858_v56, %v848_v46  ;;  %v697_v19 = vadd.f32 %v686_v63, %v660_v5  ;;  %v861_v59 = vsel %vm691_vm14, %v858_v56, %v860_v57 }
 0x3ba   : > { %v868_v48 = vadd.f32 %v862_v3, %v850_v45  ;;  %v867_v26 = vadd.f32 %v861_v59, %v849_v24 }
 0x3bb   : > { %v882_v25 = vadd.f32 %v2221_v39, %v866_v23  ;;  %v722_v49 = vadd.f32 %v2219_v38, %v697_v19  ;;  %v877_v38 = vsel %vm716_vm15, %v2221_v39, %v2223_v40 }
 0x3bc   : > { %v750_v11 = vpop.permute.xlu0 %749  ;;  %v748_v21 = vpop.permute.xlu1 %747  ;;  %v884_v22 = vadd.f32 %v878_v6, %v868_v48  ;;  %v883_v45 = vadd.f32 %v877_v38, %v867_v26 }
 0x3bd   : > { %v755_v37 = vsel %vm753_vm1, %v750_v11, %v2207_v20  ;;  %v754_v7 = vsel %vm753_vm1, %v748_v21, %v750_v11  ;;  %v2292_v28 = vadd.f32 %v748_v21, %v722_v49 }
 0x3be   : > { %v2278_v60 = vadd.f32 %v755_v37, %v724_v55  ;;  %v2280_v53 = vadd.f32 %v754_v7, %v723_v58 }
 0x3c0   : > { %v892_v2 = vpop.permute.xlu0 %891  ;;  %910 = vrot.lane.b32.xlu0 %v2278_v60, %s1762_s17  ;;  %908 = vrot.lane.b32.xlu1 %v2280_v53, %s1762_s17  ;;  %v894_v42 = vpop.permute.xlu1 %893 }
 0x3c1   : > { %v2288_v35 = vadd.f32 %v892_v2, %v882_v25  ;;  %v896_v52 = vsel %vm753_vm1, %v894_v42, %v2207_v20  ;;  %v895_v14 = vsel %vm753_vm1, %v892_v2, %v894_v42  ;;  %v1770_v2 = vmov 19  }
 0x3c2   : > { %v2294_v29 = vadd.f32 %v896_v52, %v884_v22  ;;  %v2304_v51 = vadd.f32 %v895_v14, %v883_v45  ;;  %1597 = vset.pattern.permute.xlu1 %v1770_v2 }
 0x3c4   : > { %906 = vrot.lane.b32.xlu0 %v2292_v28, %s1762_s17  ;;  %924 = vrot.lane.b32.xlu1 %v2288_v35, %s1762_s17 }
 0x3c8   : > { %928 = vrot.lane.b32.xlu1 %v2294_v29, %s1762_s17  ;;  %926 = vrot.lane.b32.xlu0 %v2304_v51, %s1762_s17 }
 0x432   : > { %v911_v20 = vpop.permute.xlu0 %910  ;;  %v909_v41 = vpop.permute.xlu1 %908 }
 0x433   : > { %v913_v39 = vsel %vm736_vm9, %v909_v41, %v911_v20  ;;  %v1771_v20 = vmov 20  }
 0x434   : > { %v917_v50 = vsel %vm422_vm0, %v913_v39, 0.0  ;;  %1600 = vset.pattern.permute.xlu0 %v1771_v20  ;;  %v2338_v39 = vld [vmem:[#allocation5] sm:$0xf] }
 0x436   : > { %v907_v40 = vpop.permute.xlu0 %906  ;;  %v925_v44 = vpop.permute.xlu1 %924 }
 0x437   : > { %v912_v31 = vsel %vm736_vm9, %v907_v40, %v909_v41 }
 0x438   : > { %v916_v16 = vsel %vm422_vm0, %v912_v31, 0.0  ;;  %v1772_v31 = vmov 4  }
 0x439   : > { %v918_v54 = vadd.f32 %v917_v50, %v916_v16  ;;  %v1773_v16 = vmov 5   ;;  %v1774_v50 = vmov 7  }
 0x43a   : > { %v927_v61 = vpop.permute.xlu0 %926  ;;  %v929_v62 = vpop.permute.xlu1 %928 }
 0x43b   : > { %v930_v63 = vsel %vm736_vm9, %v925_v44, %v927_v61  ;;  %v931_v27 = vsel %vm736_vm9, %v927_v61, %v929_v62  ;;  %919 = vadd.xlane.f32.xlu0 %v918_v54  ;;  %v1775_v62 = vmov 6  }
 0x43c   : > { %v934_v47 = vsel %vm422_vm0, %v930_v63, 0.0  ;;  %v935_v12 = vsel %vm422_vm0, %v931_v27, 0.0 }
 0x43d   : > { %v936_v36 = vadd.f32 %v935_v12, %v934_v47 }
 0x43f   : > { %937 = vadd.xlane.f32.xlu1 %v936_v36 }
 0x4c4   : > { %v920_v0 = vpop.xlane.xlu0 %919 }
 0x4c8   : > { %v938_v1 = vpop.xlane.xlu1 %937 }
 0x4c9   : > { %v939_v18 = vadd.f32 %v938_v1, %v920_v0 }
 0x4cb   : > { %v940_v10 = vmul.f32 0.001953125, %v939_v18 }
 0x4cd   : > { %v942_v30 = vsub.f32 %v2280_v53, %v940_v10  ;;  %v941_v8 = vsub.f32 %v2292_v28, %v940_v10  ;;  %v965_v43 = vsub.f32 %v2288_v35, %v940_v10  ;;  %v943_v46 = vsub.f32 %v2278_v60, %v940_v10 }
 0x4ce   : > { %v967_v32 = vsub.f32 %v2294_v29, %v940_v10  ;;  %v966_v5 = vsub.f32 %v2304_v51, %v940_v10 }
 0x4cf   : > { %v945_v56 = vmul.f32 %v942_v30, %v942_v30  ;;  %v944_v57 = vmul.f32 %v941_v8, %v941_v8  ;;  %v968_v3 = vmul.f32 %v965_v43, %v965_v43  ;;  %v946_v4 = vmul.f32 %v943_v46, %v943_v46 }
 0x4d0   : > { %v970_v48 = vmul.f32 %v967_v32, %v967_v32  ;;  %v969_v6 = vmul.f32 %v966_v5, %v966_v5 }
 0x4d1   : > { %952 = vrot.lane.b32.xlu1 %v945_v56, %s1762_s17  ;;  %950 = vrot.lane.b32.xlu0 %v944_v57, %s1762_s17 }
 0x4d5   : > { %974 = vrot.lane.b32.xlu1 %v968_v3, %s1762_s17  ;;  %954 = vrot.lane.b32.xlu0 %v946_v4, %s1762_s17 }
 0x4d9   : > { %978 = vrot.lane.b32.xlu1 %v970_v48, %s1762_s17  ;;  %976 = vrot.lane.b32.xlu0 %v969_v6, %s1762_s17 }
 0x543   : > { %v953_v33 = vpop.permute.xlu1 %952  ;;  %v951_v34 = vpop.permute.xlu0 %950 }
 0x544   : > { %v956_v23 = vsel %vm736_vm9, %v951_v34, %v953_v33 }
 0x545   : > { %v960_v58 = vsel %vm422_vm0, %v956_v23, 0.0 }
 0x547   : > { %v975_v19 = vpop.permute.xlu1 %974  ;;  %v955_v11 = vpop.permute.xlu0 %954 }
 0x548   : > { %v957_v55 = vsel %vm736_vm9, %v953_v33, %v955_v11 }
 0x549   : > { %v961_v21 = vsel %vm422_vm0, %v957_v55, 0.0 }
 0x54a   : > { %v962_v22 = vadd.f32 %v961_v21, %v960_v58 }
 0x54b   : > { %v979_v59 = vpop.permute.xlu1 %978  ;;  %v977_v37 = vpop.permute.xlu0 %976 }
 0x54c   : > { %v980_v7 = vsel %vm736_vm9, %v975_v19, %v977_v37  ;;  %v981_v24 = vsel %vm736_vm9, %v977_v37, %v979_v59  ;;  %963 = vadd.xlane.f32.xlu0 %v962_v22 }
 0x54d   : > { %v984_v25 = vsel %vm422_vm0, %v980_v7, 0.0  ;;  %v985_v26 = vsel %vm422_vm0, %v981_v24, 0.0 }
 0x54e   : > { %v986_v49 = vadd.f32 %v985_v26, %v984_v25 }
 0x550   : > { %987 = vadd.xlane.f32.xlu1 %v986_v49 }
 0x5d5   : > { %v964_v42 = vpop.xlane.xlu0 %963 }
 0x5d9   : > { %v988_v52 = vpop.xlane.xlu1 %987 }
 0x5da   : > { %v989_v38 = vadd.f32 %v988_v52, %v964_v42 }
 0x5dc   : > { %v990_v14 = vmul.f32 0.001953125, %v989_v38 }
 0x5de   : > { %v991_v45 = vadd.f32 1e-05, %v990_v14 }
 0x5e0   : > { %1608 = vrsqrt.f32 %v991_v45 }
 0x5ed   : > { %v1609_v41 = vpop.eup %1608 }
 0x5ee   : > { %v993_v40 = vmul.f32 %v2338_v39, %v1609_v41 }
 0x5f0   : > { %1002 = vperm.xlu1 %1597, %v993_v40   ;;  %v994_v44 = vmul.f32 %v993_v40, %v940_v10 }
 0x5f2   : > { %996 = vrot.lane.b32.xlu0 %v994_v44, %s1748_s20 }
 0x5f4   : > { %1598 = vset.pattern.permute.xlu1 %v1772_v31 }
 0x5f5   : > { %1023 = vperm.xlu1 %1598, %v2338_v39  }
 0x5f9   : > { %1599 = vset.pattern.permute.xlu1 %v1773_v16 }
 0x5fa   : > { %1042 = vperm.xlu1 %1599, %v2338_v39  }
 0x5fe   : > { %1602 = vset.pattern.permute.xlu1 %v1774_v50 }
 0x5ff   : > { %1086 = vperm.xlu1 %1602, %v2338_v39  }
 0x664   : > { %v997_v54 = vpop.permute.xlu0 %996 }
 0x665   : > { %v999_v61 = vsub.f32 %v2338_v39, %v997_v54 }
 0x667   : > { %1010 = vperm.xlu0 %1600, %v999_v61  }
 0x66b   : > { %1601 = vset.pattern.permute.xlu0 %v1775_v62  ;;  %v1003_v63 = vpop.permute.xlu1 %1002 }
 0x66c   : > { %1064 = vperm.xlu0 %1601, %v2338_v39   ;;  %v1005_v12 = vmul.f32 %v1003_v63, %v2292_v28  ;;  %v1006_v36 = vmul.f32 %v1003_v63, %v2280_v53  ;;  %v1016_v0 = vmul.f32 %v1003_v63, %v2288_v35  ;;  %v1007_v1 = vmul.f32 %v1003_v63, %v2278_v60 }
 0x66d   : > { %v1017_v18 = vmul.f32 %v1003_v63, %v2304_v51  ;;  %v1018_v10 = vmul.f32 %v1003_v63, %v2294_v29 }
 0x670   : > { %v2347_v27 = vpop.permute.xlu1 %1023 }
 0x675   : > { %v2349_v47 = vpop.permute.xlu1 %1042 }
 0x67a   : > { %v2361_v28 = vpop.permute.xlu1 %1086 }
 0x6e2   : > { %v1011_v30 = vpop.permute.xlu0 %1010 }
 0x6e3   : > { %v1013_v8 = vadd.f32 %v1011_v30, %v1005_v12  ;;  %v1014_v56 = vadd.f32 %v1011_v30, %v1006_v36  ;;  %v1019_v57 = vadd.f32 %v1016_v0, %v1011_v30  ;;  %v1015_v43 = vadd.f32 %v1011_v30, %v1007_v1 }
 0x6e4   : > { %v2357_v46 = vadd.f32 %v1017_v18, %v1011_v30  ;;  %v2359_v3 = vadd.f32 %v1018_v10, %v1011_v30 }
 0x6e5   : > { %v1033_v53 = vrot.slane %v1014_v56, %v1948_v9  ;;  %v1052_v35 = vrot.slane %v1014_v56, %v1954_v15  ;;  %v1074_v60 = vrot.slane %v1014_v56, %v1952_v13  ;;  %v1096_v51 = vrot.slane %v1014_v56, %v1956_v17 }
 0x6e6   : > { %v1029_v29 = vrot.slane %v1013_v8, %v1948_v9  ;;  %v1048_v4 = vrot.slane %v1013_v8, %v1954_v15  ;;  %v1070_v32 = vrot.slane %v1013_v8, %v1952_v13  ;;  %v1092_v5 = vrot.slane %v1013_v8, %v1956_v17 }
 0x6e7   : > { %v1065_v48 = vpop.permute.xlu0 %1064  ;;  %v1039_v6 = vmul.f32 %v1033_v53, %v2347_v27  ;;  %v1058_v33 = vmul.f32 %v1052_v35, %v2349_v47  ;;  %v1102_v34 = vmul.f32 %v1096_v51, %v2361_v28  ;;  %v1110_v23 = vrot.slane %v1019_v57, %v1948_v9 }
 0x6e8   : > { %v1080_v19 = vmul.f32 %v1074_v60, %v1065_v48  ;;  %v1038_v11 = vmul.f32 %v1029_v29, %v2347_v27  ;;  %v1057_v55 = vmul.f32 %v1048_v4, %v2349_v47  ;;  %v1079_v58 = vmul.f32 %v1070_v32, %v1065_v48 }
 0x6e9   : > { %v1061_v21 = vadd.f32 %v1058_v33, %v1039_v6  ;;  %v1101_v22 = vmul.f32 %v1092_v5, %v2361_v28  ;;  %v1119_v59 = vmul.f32 %v1110_v23, %v2347_v27  ;;  %v1125_v37 = vrot.slane %v1019_v57, %v1954_v15 }
 0x6ea   : > { %v1060_v7 = vadd.f32 %v1057_v55, %v1038_v11  ;;  %v1143_v24 = vrot.slane %v1019_v57, %v1952_v13  ;;  %v1161_v25 = vrot.slane %v1019_v57, %v1956_v17  ;;  %v1037_v26 = vrot.slane %v1015_v43, %v1948_v9 }
 0x6eb   : > { %v1083_v49 = vadd.f32 %v1080_v19, %v1061_v21  ;;  %v1134_v2 = vmul.f32 %v1125_v37, %v2349_v47  ;;  %v1056_v42 = vrot.slane %v1015_v43, %v1954_v15  ;;  %v1078_v52 = vrot.slane %v1015_v43, %v1952_v13 }
 0x6ec   : > { %v1082_v38 = vadd.f32 %v1079_v58, %v1060_v7  ;;  %v1152_v14 = vmul.f32 %v1143_v24, %v1065_v48  ;;  %v1170_v45 = vmul.f32 %v1161_v25, %v2361_v28  ;;  %v1040_v20 = vmul.f32 %v1037_v26, %v2347_v27 }
 0x6ed   : > { %v2388_v41 = vadd.f32 %v1102_v34, %v1083_v49  ;;  %v1137_v40 = vadd.f32 %v1134_v2, %v1119_v59  ;;  %v1059_v44 = vmul.f32 %v1056_v42, %v2349_v47  ;;  %v1081_v31 = vmul.f32 %v1078_v52, %v1065_v48 }
 0x6ee   : > { %v2391_v16 = vadd.f32 %v1101_v22, %v1082_v38  ;;  %v1100_v50 = vrot.slane %v1015_v43, %v1956_v17  ;;  %v1118_v54 = vrot.slane %v2359_v3, %v1948_v9  ;;  %v1133_v61 = vrot.slane %v2359_v3, %v1954_v15 }
 0x6ef   : > { %1181 = vrot.lane.b32.xlu0 %v2388_v41, %s1762_s17  ;;  %v1155_v62 = vadd.f32 %v1152_v14, %v1137_v40  ;;  %v1062_v63 = vadd.f32 %v1059_v44, %v1040_v20  ;;  %v1151_v12 = vrot.slane %v2359_v3, %v1952_v13  ;;  %v1169_v36 = vrot.slane %v2359_v3, %v1956_v17 }
 0x6f0   : > { %1179 = vrot.lane.b32.xlu1 %v2391_v16, %s1762_s17  ;;  %v1121_v0 = vmul.f32 %v1118_v54, %v2347_v27  ;;  %v1136_v1 = vmul.f32 %v1133_v61, %v2349_v47  ;;  %v1114_v18 = vrot.slane %v2357_v46, %v1948_v9  ;;  %v1103_v8 = vmul.f32 %v1100_v50, %v2361_v28 }
 0x6f1   : > { %v2410_v10 = vadd.f32 %v1170_v45, %v1155_v62  ;;  %v1084_v30 = vadd.f32 %v1081_v31, %v1062_v63  ;;  %v1154_v56 = vmul.f32 %v1151_v12, %v1065_v48  ;;  %v1129_v3 = vrot.slane %v2357_v46, %v1954_v15 }
 0x6f2   : > { %v1139_v57 = vadd.f32 %v1136_v1, %v1121_v0  ;;  %v1120_v43 = vmul.f32 %v1114_v18, %v2347_v27  ;;  %v1147_v53 = vrot.slane %v2357_v46, %v1952_v13  ;;  %v1172_v9 = vmul.f32 %v1169_v36, %v2361_v28 }
 0x6f3   : > { %1197 = vrot.lane.b32.xlu0 %v2410_v10, %s1762_s17  ;;  %v2420_v35 = vadd.f32 %v1103_v8, %v1084_v30  ;;  %v1135_v51 = vmul.f32 %v1129_v3, %v2349_v47  ;;  %v1165_v27 = vrot.slane %v2357_v46, %v1956_v17 }
 0x6f4   : > { %v1157_v60 = vadd.f32 %v1154_v56, %v1139_v57  ;;  %v1153_v29 = vmul.f32 %v1147_v53, %v1065_v48  ;;  %v1776_v53 = vmov 21  }
 0x6f5   : > { %1183 = vrot.lane.b32.xlu1 %v2420_v35, %s1762_s17  ;;  %v1138_v13 = vadd.f32 %v1135_v51, %v1120_v43  ;;  %v1171_v32 = vmul.f32 %v1165_v27, %v2361_v28 }
 0x6f6   : > { %v2428_v15 = vadd.f32 %v1172_v9, %v1157_v60  ;;  %1603 = vset.pattern.permute.xlu1 %v1776_v53 }
 0x6f7   : > { %v1156_v4 = vadd.f32 %v1153_v29, %v1138_v13  ;;  %v1777_v13 = vmov 22  }
 0x6f8   : > { %1201 = vrot.lane.b32.xlu0 %v2428_v15, %s1762_s17 }
 0x6f9   : > { %v2433_v5 = vadd.f32 %v1171_v32, %v1156_v4  ;;  %1605 = vset.pattern.permute.xlu0 %v1777_v13 }
 0x6fb   : > { %1199 = vrot.lane.b32.xlu1 %v2433_v5, %s1762_s17 }
 0x761   : > { %v1182_v47 = vpop.permute.xlu0 %1181 }
 0x762   : > { %v1180_v48 = vpop.permute.xlu1 %1179 }
 0x763   : > { %v1185_v17 = vsel %vm736_vm9, %v1180_v48, %v1182_v47 }
 0x764   : > { %v1189_v34 = vsel %vm422_vm0, %v1185_v17, 0.0 }
 0x765   : > { %v1198_v46 = vpop.permute.xlu0 %1197 }
 0x767   : > { %v1184_v6 = vpop.permute.xlu1 %1183 }
 0x768   : > { %v1186_v33 = vsel %vm736_vm9, %v1182_v47, %v1184_v6 }
 0x769   : > { %v1190_v23 = vsel %vm422_vm0, %v1186_v33, 0.0 }
 0x76a   : > { %v1191_v19 = vadd.f32 %v1190_v23, %v1189_v34  ;;  %v1202_v11 = vpop.permute.xlu0 %1201 }
 0x76c   : > { %1192 = vadd.xlane.f32.xlu1 %v1191_v19 }
 0x76d   : > { %v1200_v28 = vpop.permute.xlu1 %1199 }
 0x76e   : > { %v1203_v55 = vsel %vm736_vm9, %v1198_v46, %v1200_v28  ;;  %v1204_v58 = vsel %vm736_vm9, %v1200_v28, %v1202_v11 }
 0x76f   : > { %v1207_v21 = vsel %vm422_vm0, %v1203_v55, 0.0  ;;  %v1208_v22 = vsel %vm422_vm0, %v1204_v58, 0.0 }
 0x770   : > { %v1209_v59 = vadd.f32 %v1208_v22, %v1207_v21 }
 0x772   : > { %1210 = vadd.xlane.f32.xlu0 %v1209_v59 }
 0x7f5   : > { %v1193_v37 = vpop.xlane.xlu1 %1192 }
 0x7fb   : > { %v1211_v7 = vpop.xlane.xlu0 %1210 }
 0x7fc   : > { %v1212_v24 = vadd.f32 %v1211_v7, %v1193_v37 }
 0x7fe   : > { %v1213_v25 = vmul.f32 0.001953125, %v1212_v24 }
 0x800   : > { %v1215_v26 = vsub.f32 %v2388_v41, %v1213_v25  ;;  %v1214_v49 = vsub.f32 %v2391_v16, %v1213_v25  ;;  %v1216_v52 = vsub.f32 %v2420_v35, %v1213_v25  ;;  %v1238_v38 = vsub.f32 %v2410_v10, %v1213_v25 }
 0x801   : > { %v1239_v20 = vsub.f32 %v2433_v5, %v1213_v25  ;;  %v1240_v40 = vsub.f32 %v2428_v15, %v1213_v25 }
 0x802   : > { %v1218_v2 = vmul.f32 %v1215_v26, %v1215_v26  ;;  %v1217_v42 = vmul.f32 %v1214_v49, %v1214_v49  ;;  %v1219_v14 = vmul.f32 %v1216_v52, %v1216_v52  ;;  %v1241_v45 = vmul.f32 %v1238_v38, %v1238_v38 }
 0x803   : > { %v1242_v44 = vmul.f32 %v1239_v20, %v1239_v20  ;;  %v1243_v31 = vmul.f32 %v1240_v40, %v1240_v40 }
 0x804   : > { %1225 = vrot.lane.b32.xlu1 %v1218_v2, %s1762_s17  ;;  %1223 = vrot.lane.b32.xlu0 %v1217_v42, %s1762_s17 }
 0x808   : > { %1227 = vrot.lane.b32.xlu1 %v1219_v14, %s1762_s17  ;;  %1247 = vrot.lane.b32.xlu0 %v1241_v45, %s1762_s17 }
 0x80c   : > { %1249 = vrot.lane.b32.xlu1 %v1242_v44, %s1762_s17  ;;  %1251 = vrot.lane.b32.xlu0 %v1243_v31, %s1762_s17 }
 0x876   : > { %v1226_v50 = vpop.permute.xlu1 %1225  ;;  %v1224_v54 = vpop.permute.xlu0 %1223 }
 0x877   : > { %v1229_v61 = vsel %vm736_vm9, %v1224_v54, %v1226_v50 }
 0x878   : > { %v1233_v36 = vsel %vm422_vm0, %v1229_v61, 0.0 }
 0x87a   : > { %v1228_v62 = vpop.permute.xlu1 %1227  ;;  %v1248_v63 = vpop.permute.xlu0 %1247 }
 0x87b   : > { %v1230_v12 = vsel %vm736_vm9, %v1226_v50, %v1228_v62 }
 0x87c   : > { %v1234_v0 = vsel %vm422_vm0, %v1230_v12, 0.0 }
 0x87d   : > { %v1235_v1 = vadd.f32 %v1234_v0, %v1233_v36 }
 0x87e   : > { %v1250_v18 = vpop.permute.xlu1 %1249  ;;  %v1252_v30 = vpop.permute.xlu0 %1251 }
 0x87f   : > { %v1253_v8 = vsel %vm736_vm9, %v1248_v63, %v1250_v18  ;;  %v1254_v56 = vsel %vm736_vm9, %v1250_v18, %v1252_v30  ;;  %1236 = vadd.xlane.f32.xlu1 %v1235_v1 }
 0x880   : > { %v1257_v57 = vsel %vm422_vm0, %v1253_v8, 0.0  ;;  %v1258_v43 = vsel %vm422_vm0, %v1254_v56, 0.0 }
 0x881   : > { %v1259_v3 = vadd.f32 %v1258_v43, %v1257_v57 }
 0x883   : > { %1260 = vadd.xlane.f32.xlu0 %v1259_v3 }
 0x908   : > { %v1237_v9 = vpop.xlane.xlu1 %1236 }
 0x90c   : > { %v1261_v60 = vpop.xlane.xlu0 %1260 }
 0x90d   : > { %v1262_v51 = vadd.f32 %v1261_v60, %v1237_v9 }
 0x90f   : > { %v1263_v29 = vmul.f32 0.001953125, %v1262_v51 }
 0x911   : > { %v1264_v27 = vadd.f32 1e-05, %v1263_v29 }
 0x913   : > { %1610 = vrsqrt.f32 %v1264_v27 }
 0x920   : > { %v1611_v4 = vpop.eup %1610 }
 0x921   : > { %v1266_v32 = vmul.f32 %v2338_v39, %v1611_v4 }
 0x923   : > { %1275 = vperm.xlu1 %1603, %v1266_v32   ;;  %v1267_v47 = vmul.f32 %v1266_v32, %v1213_v25 }
 0x925   : > { %1269 = vrot.lane.b32.xlu0 %v1267_v47, %s1748_s20 }
 0x927   : > { %1604 = vset.pattern.permute.xlu1 %v1777_v13 }
 0x997   : > { %v1270_v48 = vpop.permute.xlu0 %1269 }
 0x998   : > { %v1272_v17 = vsub.f32 %v2338_v39, %v1270_v48 }
 0x99a   : > { %1283 = vperm.xlu1 %1604, %v1272_v17  }
 0x99e   : > { %v1276_v46 = vpop.permute.xlu1 %1275 }
 0x99f   : > { %v1278_v6 = vmul.f32 %v1276_v46, %v2391_v16  ;;  %v1279_v33 = vmul.f32 %v1276_v46, %v2388_v41  ;;  %v1280_v34 = vmul.f32 %v1276_v46, %v2420_v35  ;;  %v1292_v23 = vmul.f32 %v1276_v46, %v2410_v10 }
 0x9a0   : > { %v1293_v19 = vmul.f32 %v1276_v46, %v2433_v5  ;;  %v1294_v21 = vmul.f32 %v1276_v46, %v2428_v15 }
 0xa15   : > { %v1284_v11 = vpop.permute.xlu1 %1283 }
 0xa16   : > { %v1288_v28 = vadd.f32 %v1284_v11, %v1280_v34  ;;  %v1286_v55 = vadd.f32 %v1284_v11, %v1278_v6  ;;  %v1287_v58 = vadd.f32 %v1284_v11, %v1279_v33  ;;  %v1295_v22 = vadd.f32 %v1292_v23, %v1284_v11 }
 0xa17   : > { %v1296_v39 = vadd.f32 %v1293_v19, %v1284_v11  ;;  %v1297_v16 = vadd.f32 %v1294_v21, %v1284_v11 }
 0xa18   : > { %v1291_v59 = vmax.f32 %v1288_v28, 0.0  ;;  %v1289_v37 = vmax.f32 %v1286_v55, 0.0  ;;  %v1290_v7 = vmax.f32 %v1287_v58, 0.0  ;;  %v1298_v35 = vmax.f32 %v1295_v22, 0.0 }
 0xa19   : > { %v1299_v10 = vmax.f32 %v1296_v39, 0.0  ;;  %v1300_v5 = vmax.f32 %v1297_v16, 0.0 }
 0xa1a   : > { %1307 = vrot.lane.b32.xlu1 %v1291_v59, %s1762_s17  ;;  %v1304_v41 = vcombine.low %v1289_v37, %v1290_v7 }
 0xa1b   : > { %v1318_v24 = vcombine.low %v1298_v35, %v1299_v10 }
 0xa1c   : > { %1305 = vrot.lane.b32.xlu0 %v1304_v41, %s1762_s17 }
 0xa1e   : > { %1321 = vrot.lane.b32.xlu1 %v1300_v5, %s1762_s17 }
 0xa20   : > { %1319 = vrot.lane.b32.xlu0 %v1318_v24, %s1762_s17 }
 0xa8c   : > { %v1308_v15 = vpop.permute.xlu1 %1307 }
 0xa8d   : > { %v1310_v26 = vrot.slane %v1308_v15, 4 }
 0xa8e   : > { %v1306_v25 = vpop.permute.xlu0 %1305 }
 0xa8f   : > { %v1309_v49 = vrot.slane %v1306_v25, 4 }
 0xa90   : > { %v1322_v2 = vpop.permute.xlu1 %1321 }
 0xa91   : > { %v1311_v42 = vsel %vm422_vm0, %v1309_v49, %v1310_v26  ;;  %v1324_v14 = vrot.slane %v1322_v2, 4 }
 0xa92   : > { %v1312_v52 = vsel %vm736_vm9, %v1306_v25, %v1311_v42  ;;  %v1320_v38 = vpop.permute.xlu0 %1319 }
 0xa93   : > { %1314 = vst [vmem:[%s1932_s23] sm:$0xff] %v1312_v52  ;;  %v1323_v45 = vrot.slane %v1320_v38, 4 }
 0xa95   : > { %v1325_v20 = vsel %vm422_vm0, %v1323_v45, %v1324_v14 }
 0xa96   : > { %v1326_v40 = vsel %vm736_vm9, %v1320_v38, %v1325_v20 }
 0xa97   : > { %1445 = vst [vmem:[%s1932_s23 + $0x8] sm:$0xff] %v1326_v40 }
 0xa98 PF: > { %s1452_s8 = sshll.u32 %s1818_s13, 7  ;;  %s1344_s26 = sshll.u32 %s1932_s23, 4  ;;  %s2491_s26 = int_to_ptr.vmem [resolvable:$true] %s1344_s26 }
 0xa99   : > { %s2488_s25 = scalar_lea.hbm %s2536_s2, %s1452_s8  ;;  %s1331_s20 = scalar_lea.sflag [#allocation4], %s1918_s19 }
 0xa9a   : > { %s1667_s28 = scalar_lea.vmem %s2491_s26, 256  ;;  %p2554_p8 = scmp.ne.s32.totalorder %s2543_s21, 0 }
 0xa9b   : > { %p1668_p0 = scmp.ne.s32.totalorder %s2491_s26, %s1667_s28  ;;  %s1778_s7 = smov [#allocation7]  }
 0xa9c   : > { %s1671_s16 = sshll.u32 %s1778_s7, 4  ;;  %s1672_s16 = int_to_ptr.vmem [resolvable:$false] %s1671_s16 }
 0xa9d   : > { %p1669_p9 = pnand %p1668_p0, %p2554_p8  ;;  %s1673_s13 = scalar_lea.vmem %s1672_s16, 512 }
 0xa9e   : > { %p1674_p4 = scmp.lt.s32.totalorder %s2491_s26, %s1672_s16  ;;  %p1675_p7 = scmp.lt.s32.totalorder %s1673_s13, %s1667_s28 }
 0xa9f   : > { %p1670_p10 = pneg %p1669_p9 }
 0xaa0   : > { %p1676_p5 = por %p1675_p7, %p1674_p4 }
 0xaa2   : > { %p1677_p6 = pnand %p1676_p5, %p1670_p10 }
 0xaa4   : > { %1680 = shalt.err (!%p1677_p6)
}
 0xaa5   : > { %s1681_s23 = scalar_lea.hbm %s2488_s25, 256  ;;  %s1685_s30 = scalar_lea.hbm %s2536_s2, 512 }
 0xaa6   : > { %p1682_p12 = scmp.ne.s32.totalorder %s2488_s25, %s1681_s23  ;;  %p1686_p3 = scmp.lt.s32.totalorder %s2488_s25, %s2536_s2 }
 0xaa7   : > { %p1687_p1 = scmp.lt.s32.totalorder %s1685_s30, %s1681_s23 }
 0xaa8   : > { %p1683_p11 = pnand %p1682_p12, %p2554_p8 }
 0xaa9   : > { %p1688_p2 = por %p1687_p1, %p1686_p3 }
 0xaaa   : > { %p1684_p13 = pneg %p1683_p11 }
 0xaac   : > { %p1689_p0 = pnand %p1688_p2, %p1684_p13 }
 0xaae   : > { %1692 = shalt.err (!%p1689_p0)
}
 0xaaf   : > { %s1779_s4 = smov 128   ;;  %s1780_s5 = smov 256  }
 0xab0   : > { %s1781_s6 = smov 8  }
 0xab1   : > { %1459 = dma.vmem_to_hbm [thread:$0]  (%p2554_p8), %s2491_s26, 256, %s2488_s25, %s1331_s20, %s1779_s4, %s1780_s5, %s1781_s6  }
 0xab2 PF: > { %s1359_s8 = sand.u32 1, %s1723_s9   ;;  %p2555_p9 = scmp.ne.s32.totalorder %s2544_s22, 0 }
 0xab3   : > { %p2556_p10 = scmp.ge.s32.totalorder %s1735_s12, 2  ;;  %s1360_s14 = scalar_lea.sflag [#allocation4], %s1359_s8 }
 0xab5   : > { %p1470_p4 = pnand %p2556_p10, %p2555_p9 }
 0xab7   : > { %p1471_p7 = pneg %p1470_p4 }
 0xab9   : > { %1718 = dma.done.wait (%p1471_p7), %s1360_s14, 256  }
 0xaba   : > { %1720 = vsyncadd (%p1471_p7), %s1360_s14, 4294967040  ;;  %p16_p5 = scmp.ge.s32.totalorder %s1822_s15, 4   ;;  %s2557_s9 = smov %s1727_s10 }
 0xabb   : > { %s2558_s10 = smov %s1731_s11  ;;  %s2559_s11 = smov %s1834_s18 }
 0xabc   : > { %s2560_s12 = smov %s1822_s15  ;;  %18 = sbr.rel (!%p16_p5) target bundleno = 6 (0x6), region = 87 }
 0xac1   :  { %1365 = vsyncpa [#allocation3], 1 }
 0xac2   :  { %1367 = vsyncpa [#allocation3 + $0x1], 1 }
 0xac3   :  { %1368 = vsyncpa [#allocation6], 1 }
 0xac4   :  { %1369 = vsyncpa [#allocation4], 1 }
 0xac5   :  { %1371 = vsyncpa [#allocation4 + $0x1], 1 }

</bundles_post_ra>
